<compile_context>
chip_gen: v7x
topology: tpu7x:2x2x1
jax: 0.10.0
libtpu: 0.0.40
codegen_flags: <defaults>
</compile_context>

<pallas_src>
import math

import jax
import jax.numpy as jnp
from jax import lax
from jax.experimental import pallas as pl
from jax.experimental.pallas import tpu as pltpu


# --------------------- packed parameter slab layouts (static) -----------------

W_COLS = 128                     # lane width of the weight slab = max in_features


def _build_w_layout():
    # name -> (row_offset, out_features, in_features); weights stored (out, in).
    names_dims = [
        ("wh2", 32, 8), ("wh3", 128, 32),
        ("wg1r", 64, 128),
        ("wg2", 32, 64), ("wg3", 16, 32), ("wg4", 8, 16), ("wg5", 2, 8),
    ]
    layout, off = {}, 0
    for name, dout, din in names_dims:
        layout[name] = (off, dout, din)
        off += ((dout + 7) // 8) * 8          # keep every block 8-row aligned
    return layout, off


W_LAYOUT, W_ROWS = _build_w_layout()           # W_ROWS == 288 (multiple of 8)

# Column-vector slab: biases + the K=2 (net_h layer 1) and K=1 (t_x) weight
# columns that are applied on the VPU.  Stored (N_COLS, 128, 1), zero padded.
C_LAYOUT = {"bh1": (0, 8), "bh2": (1, 32), "bh3": (2, 128), "bg1": (3, 64),
            "bg2": (4, 32), "bg3": (5, 16), "bg4": (6, 8), "bg5": (7, 2),
            "wh1x": (8, 8), "wh1y": (9, 8), "wg1x": (10, 64)}
N_COLS = 11

LOG_2PI = math.log(2.0 * math.pi)


def pack_params(params):
    """Pack the 16 (in,out)-convention params into the two kernel slabs."""
    (wh1, bh1, wh2, bh2, wh3, bh3,
     wg1, bg1, wg2, bg2, wg3, bg3, wg4, bg4, wg5, bg5) = params

    # MXU weights, transposed to (out_features, in_features).
    weights = {"wh2": wh2.T, "wh3": wh3.T, "wg1r": wg1[:128, :].T,
               "wg2": wg2.T, "wg3": wg3.T, "wg4": wg4.T, "wg5": wg5.T}
    w_slab = jnp.zeros((W_ROWS, W_COLS), jnp.float32)
    for name, w in weights.items():
        off, dout, din = W_LAYOUT[name]
        w_slab = w_slab.at[off:off + dout, :din].set(w.astype(jnp.float32))

    # Column vectors (biases + VPU weight columns).
    cols = {"bh1": bh1, "bh2": bh2, "bh3": bh3, "bg1": bg1, "bg2": bg2,
            "bg3": bg3, "bg4": bg4, "bg5": bg5,
            "wh1x": wh1[0, :], "wh1y": wh1[1, :], "wg1x": wg1[128, :]}
    c_slab = jnp.zeros((N_COLS, 128, 1), jnp.float32)
    for name, v in cols.items():
        j, n = C_LAYOUT[name]
        c_slab = c_slab.at[j, :n, 0].set(v.reshape(-1).astype(jnp.float32))
    return w_slab, c_slab


# ----------------------------- Pallas kernel ----------------------------------

def make_cnp_kernel(n_obs, n_t, bb):
    p_o = bb * n_obs
    p_t = bb * n_t

    def kernel(obs_ref, tgt_ref, w_ref, c_ref, out_ref):
        f32 = jnp.float32

        def w(name):
            r0, dout, din = W_LAYOUT[name]
            return w_ref[r0:r0 + dout, 0:din]            # (out, in)

        def col(name):
            j, n = C_LAYOUT[name]
            return c_ref[j, 0:n, :]                      # (n, 1)

        obs = obs_ref[0]                                 # (2, p_o): rows x, y
        tgt = tgt_ref[0]                                 # (2, p_t): rows x, y
        ox, oy = obs[0:1, :], obs[1:2, :]
        tx, ty = tgt[0:1, :], tgt[1:2, :]

        # ---- net_h : 2 -> 8 -> 32 -> 128 (features on sublanes, points on lanes)
        # K=2 first layer on the VPU (broadcast multiply-add).
        h = jnp.maximum(col("wh1x") * ox + col("wh1y") * oy + col("bh1"), 0.0)
        h = jnp.maximum(jnp.dot(w("wh2"), h, preferred_element_type=f32)
                        + col("bh2"), 0.0)               # (32, p_o)
        h = jnp.dot(w("wh3"), h, preferred_element_type=f32) + col("bh3")  # (128, p_o)

        # ---- per-problem mean over its n_obs points via block-averaging on MXU
        ri = lax.broadcasted_iota(jnp.int32, (p_o, bb), 0)
        ci = lax.broadcasted_iota(jnp.int32, (p_o, bb), 1)
        avg = jnp.where((ri >= ci * n_obs) & (ri < (ci + 1) * n_obs),
                        1.0 / n_obs, 0.0).astype(f32)    # (p_o, bb)
        r = jnp.dot(h, avg, preferred_element_type=f32)  # (128, bb)

        # ---- Net_g on concat([r, t_x]) via split first layer
        rg = jnp.dot(w("wg1r"), r, preferred_element_type=f32) + col("bg1")  # (64, bb)
        ri2 = lax.broadcasted_iota(jnp.int32, (bb, p_t), 0)
        ci2 = lax.broadcasted_iota(jnp.int32, (bb, p_t), 1)
        expand = jnp.where((ci2 >= ri2 * n_t) & (ci2 < (ri2 + 1) * n_t),
                           1.0, 0.0).astype(f32)         # (bb, p_t)
        rg_e = jnp.dot(rg, expand, preferred_element_type=f32)               # (64, p_t)

        g = jnp.maximum(rg_e + col("wg1x") * tx, 0.0)    # K=1 t_x path on VPU
        g = jnp.maximum(jnp.dot(w("wg2"), g, preferred_element_type=f32)
                        + col("bg2"), 0.0)               # (32, p_t)
        g = jnp.maximum(jnp.dot(w("wg3"), g, preferred_element_type=f32)
                        + col("bg3"), 0.0)               # (16, p_t)
        g = jnp.maximum(jnp.dot(w("wg4"), g, preferred_element_type=f32)
                        + col("bg4"), 0.0)               # (8, p_t)
        phi = jnp.dot(w("wg5"), g, preferred_element_type=f32) + col("bg5")  # (2, p_t)

        mu = phi[0:1, :]
        s0 = phi[1:2, :]
        # torch softplus(beta=1, threshold=20), applied only to the sig row.
        sig = jnp.where(s0 > 20.0, s0,
                        jnp.log1p(jnp.exp(jnp.minimum(s0, 20.0))))

        # Closed-form 1-D normal log-pdf of target y under N(mu, sig^2).
        inv_sig = 1.0 / sig
        z = (ty - mu) * inv_sig
        lp = (-0.5 * LOG_2PI) - jnp.log(sig) - 0.5 * z * z                   # (1, p_t)

        out_ref[0] = jnp.concatenate([mu, sig, lp], axis=0)                  # (3, p_t)

    return kernel


# ------------------------------- Wrapper ---------------------------------------

def cnp_net_forward(O, T, params, bb=16):
    """Batched CNP forward.

    O: (B, n_obs, 2) context (x, y) pairs.
    T: (B, n_t, 2) target (x, y) pairs.
    Returns mu (B, n_t, 1), sig (B, n_t, 1), mean log-prob (B,).
    """
    B, n_obs, _ = O.shape
    _, n_t, _ = T.shape

    steps = pl.cdiv(B, bb)
    bp = steps * bb
    p_o, p_t = bb * n_obs, bb * n_t

    w_slab, c_slab = pack_params(params)

    if bp != B:   # pad with dummy problems; sliced off after the kernel
        O = jnp.concatenate([O, jnp.zeros((bp - B, n_obs, 2), O.dtype)], axis=0)
        T = jnp.concatenate([T, jnp.zeros((bp - B, n_t, 2), T.dtype)], axis=0)

    # Lane-dense input slabs: (steps, 2, points) with row 0 = x, row 1 = y.
    obs_slab = jnp.stack([O[..., 0].reshape(steps, p_o),
                          O[..., 1].reshape(steps, p_o)], axis=1).astype(jnp.float32)
    tgt_slab = jnp.stack([T[..., 0].reshape(steps, p_t),
                          T[..., 1].reshape(steps, p_t)], axis=1).astype(jnp.float32)

    kernel = make_cnp_kernel(n_obs, n_t, bb)

    out = pl.pallas_call(
        kernel,
        grid=(steps,),
        in_specs=[
            pl.BlockSpec((1, 2, p_o), lambda s: (s, 0, 0)),
            pl.BlockSpec((1, 2, p_t), lambda s: (s, 0, 0)),
            pl.BlockSpec((W_ROWS, W_COLS), lambda s: (0, 0)),      # invariant
            pl.BlockSpec((N_COLS, 128, 1), lambda s: (0, 0, 0)),   # invariant
        ],
        out_specs=pl.BlockSpec((1, 3, p_t), lambda s: (s, 0, 0)),
        out_shape=jax.ShapeDtypeStruct((steps, 3, p_t), jnp.float32),
        compiler_params=pltpu.CompilerParams(dimension_semantics=("parallel",)),
    )(obs_slab, tgt_slab, w_slab, c_slab)

    mu = out[:, 0, :].reshape(bp, n_t)[:B][..., None]
    sig = out[:, 1, :].reshape(bp, n_t)[:B][..., None]
    lp = out[:, 2, :].reshape(bp, n_t)[:B].mean(axis=1)
    return mu, sig, lp


# ------------------------ Deterministic parameter init -------------------------

def init_params(key):
    dims_h = [2, 8, 32, 128]                  # net_h: 2 -> 8 -> 32 -> 128
    dims_g = [129, 64, 32, 16, 8, 2]          # Net_g: 129 -> 64 -> 32 -> 16 -> 8 -> 2

    def lin(k, din, dout):
        kw, kb = jax.random.split(k)
        w = jax.random.normal(kw, (din, dout), jnp.float32) / jnp.sqrt(jnp.float32(din))
        b = 0.1 * jax.random.normal(kb, (1, dout), jnp.float32)
        return w, b

    n_layers = (len(dims_h) - 1) + (len(dims_g) - 1)
    keys = jax.random.split(key, n_layers)
    params, ki = [], 0
    for i in range(1, len(dims_h)):
        params.extend(lin(keys[ki], dims_h[i - 1], dims_h[i])); ki += 1
    for i in range(1, len(dims_g)):
        params.extend(lin(keys[ki], dims_g[i - 1], dims_g[i])); ki += 1
    return tuple(params)


# ----------------------------- Pure-JAX reference ------------------------------

def reference(O, T, params):
    (wh1, bh1, wh2, bh2, wh3, bh3,
     wg1, bg1, wg2, bg2, wg3, bg3, wg4, bg4, wg5, bg5) = params

    h = jax.nn.relu(O @ wh1 + bh1)
    h = jax.nn.relu(h @ wh2 + bh2)
    h = h @ wh3 + bh3
    r = jnp.mean(h, axis=0)                                   # (128,)
    r = jnp.broadcast_to(r[None, :], (T.shape[0], 128))
    xr = jnp.concatenate([r, T[:, 0:1]], axis=1)              # (n_t, 129)
    g = jax.nn.relu(xr @ wg1 + bg1)
    g = jax.nn.relu(g @ wg2 + bg2)
    g = jax.nn.relu(g @ wg3 + bg3)
    g = jax.nn.relu(g @ wg4 + bg4)
    phi = g @ wg5 + bg5
    mu = phi[:, :1]
    sig = jnp.where(phi[:, 1:] > 20.0, phi[:, 1:],
                    jnp.log1p(jnp.exp(jnp.minimum(phi[:, 1:], 20.0))))
    y = T[:, 1:2]
    lp = -0.5 * jnp.log(2.0 * jnp.pi) - jnp.log(sig) - 0.5 * ((y - mu) / sig) ** 2
    return mu, sig, jnp.mean(lp)


# --------------------------------- Main -----------------------------------------

if __name__ == "__main__":
    key = jax.random.PRNGKey(0)
    k_o, k_t, k_p = jax.random.split(key, 3)

    # 32 problems, 16 per grid step -> 2 lane-dense steps (128 obs / 256 targets each).
    B, n_obs, n_tgt, BB = 32, 8, 16, 16
    O = jax.random.normal(k_o, (B, n_obs, 2), jnp.float32)    # context (x, y) pairs
    T = jax.random.normal(k_t, (B, n_tgt, 2), jnp.float32)    # target (x, y) pairs
    params = init_params(k_p)

    mu, sig, lp = cnp_net_forward(O, T, params, bb=BB)
    jax.block_until_ready((mu, sig, lp))

    for b in range(B):
        mu_r, sig_r, lp_r = reference(O[b], T[b], params)
        assert jnp.allclose(mu[b], mu_r, atol=1e-4, rtol=1e-4), "mu mismatch"
        assert jnp.allclose(sig[b], sig_r, atol=1e-4, rtol=1e-4), "sig mismatch"
        assert jnp.allclose(lp[b], lp_r, atol=1e-4, rtol=1e-4), "log_prob mismatch"

    print("KERNEL_OK")
</pallas_src>

<mosaic_0001>
module attributes {stable_mosaic.version = 11 : i64} {
  func.func @kernel(%arg0: i32, %arg1: memref<1x2x128xf32, #tpu.memory_space<vmem>>, %arg2: memref<1x2x256xf32, #tpu.memory_space<vmem>>, %arg3: memref<288x128xf32, #tpu.memory_space<vmem>>, %arg4: memref<11x128x1xf32, #tpu.memory_space<vmem>>, %arg5: memref<1x3x256xf32, #tpu.memory_space<vmem>>) attributes {dimension_semantics = [#tpu.dimension_semantics<parallel>], iteration_bounds = array<i64: 2>, scalar_prefetch = 0 : i64, scratch_operands = 0 : i64, tpu.core_type = #tpu.core_type<tc>, window_params = [{transform_indices = @transform_0, window_bounds = array<i64: 1, 2, 128>}, {transform_indices = @transform_1, window_bounds = array<i64: 1, 2, 256>}, {pipeline_mode = #tpu.pipeline_mode<synchronous>, transform_indices = @transform_2, window_bounds = array<i64: 288, 128>}, {pipeline_mode = #tpu.pipeline_mode<synchronous>, transform_indices = @transform_3, window_bounds = array<i64: 11, 128, 1>}, {transform_indices = @transform_4, window_bounds = array<i64: 1, 3, 256>}]} {
    %c0 = arith.constant 0 : index
    %c0_0 = arith.constant 0 : index
    %c0_1 = arith.constant 0 : index
    %0 = vector.load %arg1[%c0, %c0_0, %c0_1] : memref<1x2x128xf32, #tpu.memory_space<vmem>>, vector<1x2x128xf32>
    %1 = vector.shape_cast %0 : vector<1x2x128xf32> to vector<2x128xf32>
    %c0_2 = arith.constant 0 : index
    %c0_3 = arith.constant 0 : index
    %c0_4 = arith.constant 0 : index
    %2 = vector.load %arg2[%c0_2, %c0_3, %c0_4] : memref<1x2x256xf32, #tpu.memory_space<vmem>>, vector<1x2x256xf32>
    %3 = vector.shape_cast %2 : vector<1x2x256xf32> to vector<2x256xf32>
    %4 = vector.extract_strided_slice %1 {offsets = [0, 0], sizes = [1, 128], strides = [1, 1]} : vector<2x128xf32> to vector<1x128xf32>
    %5 = vector.extract_strided_slice %1 {offsets = [1, 0], sizes = [1, 128], strides = [1, 1]} : vector<2x128xf32> to vector<1x128xf32>
    %6 = vector.extract_strided_slice %3 {offsets = [0, 0], sizes = [1, 256], strides = [1, 1]} : vector<2x256xf32> to vector<1x256xf32>
    %7 = vector.extract_strided_slice %3 {offsets = [1, 0], sizes = [1, 256], strides = [1, 1]} : vector<2x256xf32> to vector<1x256xf32>
    %c8 = arith.constant 8 : index
    %c0_5 = arith.constant 0 : index
    %c0_6 = arith.constant 0 : index
    %8 = vector.load %arg4[%c8, %c0_5, %c0_6] : memref<11x128x1xf32, #tpu.memory_space<vmem>>, vector<1x8x1xf32>
    %9 = vector.shape_cast %8 : vector<1x8x1xf32> to vector<8x1xf32>
    %10 = vector.broadcast %9 : vector<8x1xf32> to vector<8x128xf32>
    %11 = vector.broadcast %4 : vector<1x128xf32> to vector<8x128xf32>
    %12 = arith.mulf %10, %11 : vector<8x128xf32>
    %c9 = arith.constant 9 : index
    %c0_7 = arith.constant 0 : index
    %c0_8 = arith.constant 0 : index
    %13 = vector.load %arg4[%c9, %c0_7, %c0_8] : memref<11x128x1xf32, #tpu.memory_space<vmem>>, vector<1x8x1xf32>
    %14 = vector.shape_cast %13 : vector<1x8x1xf32> to vector<8x1xf32>
    %15 = vector.broadcast %14 : vector<8x1xf32> to vector<8x128xf32>
    %16 = vector.broadcast %5 : vector<1x128xf32> to vector<8x128xf32>
    %17 = arith.mulf %15, %16 : vector<8x128xf32>
    %18 = arith.addf %12, %17 : vector<8x128xf32>
    %c0_9 = arith.constant 0 : index
    %c0_10 = arith.constant 0 : index
    %c0_11 = arith.constant 0 : index
    %19 = vector.load %arg4[%c0_9, %c0_10, %c0_11] : memref<11x128x1xf32, #tpu.memory_space<vmem>>, vector<1x8x1xf32>
    %20 = vector.shape_cast %19 : vector<1x8x1xf32> to vector<8x1xf32>
    %21 = vector.broadcast %20 : vector<8x1xf32> to vector<8x128xf32>
    %22 = arith.addf %18, %21 : vector<8x128xf32>
    %cst = arith.constant 0.000000e+00 : f32
    %23 = vector.broadcast %cst : f32 to vector<8x128xf32>
    %24 = arith.maximumf %22, %23 : vector<8x128xf32>
    %c0_12 = arith.constant 0 : index
    %c0_13 = arith.constant 0 : index
    %25 = vector.load %arg3[%c0_12, %c0_13] : memref<288x128xf32, #tpu.memory_space<vmem>>, vector<32x8xf32>
    %cst_14 = arith.constant dense<0.000000e+00> : vector<32x128xf32>
    %26 = tpu.matmul %25, %24, %cst_14 {dimension_numbers = #tpu.dot_dimension_numbers<[1], [0], [0], [1], [0, 0, 1, 1], [], []>} : vector<32x8xf32>, vector<8x128xf32>, vector<32x128xf32> -> vector<32x128xf32>
    %c1 = arith.constant 1 : index
    %c0_15 = arith.constant 0 : index
    %c0_16 = arith.constant 0 : index
    %27 = vector.load %arg4[%c1, %c0_15, %c0_16] : memref<11x128x1xf32, #tpu.memory_space<vmem>>, vector<1x32x1xf32>
    %28 = vector.shape_cast %27 : vector<1x32x1xf32> to vector<32x1xf32>
    %29 = vector.broadcast %28 : vector<32x1xf32> to vector<32x128xf32>
    %30 = arith.addf %26, %29 : vector<32x128xf32>
    %cst_17 = arith.constant 0.000000e+00 : f32
    %31 = vector.broadcast %cst_17 : f32 to vector<32x128xf32>
    %32 = arith.maximumf %30, %31 : vector<32x128xf32>
    %c32 = arith.constant 32 : index
    %c0_18 = arith.constant 0 : index
    %33 = vector.load %arg3[%c32, %c0_18] : memref<288x128xf32, #tpu.memory_space<vmem>>, vector<128x32xf32>
    %cst_19 = arith.constant dense<0.000000e+00> : vector<128x128xf32>
    %34 = tpu.matmul %33, %32, %cst_19 {dimension_numbers = #tpu.dot_dimension_numbers<[1], [0], [0], [1], [0, 0, 1, 1], [], []>} : vector<128x32xf32>, vector<32x128xf32>, vector<128x128xf32> -> vector<128x128xf32>
    %c2 = arith.constant 2 : index
    %c0_20 = arith.constant 0 : index
    %c0_21 = arith.constant 0 : index
    %35 = vector.load %arg4[%c2, %c0_20, %c0_21] : memref<11x128x1xf32, #tpu.memory_space<vmem>>, vector<1x128x1xf32>
    %36 = vector.shape_cast %35 : vector<1x128x1xf32> to vector<128x1xf32>
    %37 = vector.broadcast %36 : vector<128x1xf32> to vector<128x128xf32>
    %38 = arith.addf %34, %37 : vector<128x128xf32>
    %39 = tpu.iota {dimensions = array<i32: 0>} : vector<128x16xi32>
    %40 = tpu.iota {dimensions = array<i32: 1>} : vector<128x16xi32>
    %c8_i32 = arith.constant 8 : i32
    %41 = vector.broadcast %c8_i32 : i32 to vector<128x16xi32>
    %42 = arith.muli %40, %41 : vector<128x16xi32>
    %43 = arith.cmpi sge, %39, %42 : vector<128x16xi32>
    %c1_i32 = arith.constant 1 : i32
    %44 = vector.broadcast %c1_i32 : i32 to vector<128x16xi32>
    %45 = arith.addi %40, %44 : vector<128x16xi32>
    %c8_i32_22 = arith.constant 8 : i32
    %46 = vector.broadcast %c8_i32_22 : i32 to vector<128x16xi32>
    %47 = arith.muli %45, %46 : vector<128x16xi32>
    %48 = arith.cmpi slt, %39, %47 : vector<128x16xi32>
    %49 = arith.andi %43, %48 : vector<128x16xi1>
    %cst_23 = arith.constant 1.250000e-01 : f32
    %cst_24 = arith.constant 0.000000e+00 : f32
    %50 = vector.broadcast %cst_23 : f32 to vector<128x16xf32>
    %51 = vector.broadcast %cst_24 : f32 to vector<128x16xf32>
    %52 = arith.select %49, %50, %51 : vector<128x16xi1>, vector<128x16xf32>
    %cst_25 = arith.constant dense<0.000000e+00> : vector<128x16xf32>
    %53 = tpu.matmul %38, %52, %cst_25 {dimension_numbers = #tpu.dot_dimension_numbers<[1], [0], [0], [1], [0, 0, 1, 1], [], []>} : vector<128x128xf32>, vector<128x16xf32>, vector<128x16xf32> -> vector<128x16xf32>
    %c160 = arith.constant 160 : index
    %c0_26 = arith.constant 0 : index
    %54 = vector.load %arg3[%c160, %c0_26] : memref<288x128xf32, #tpu.memory_space<vmem>>, vector<64x128xf32>
    %cst_27 = arith.constant dense<0.000000e+00> : vector<64x16xf32>
    %55 = tpu.matmul %54, %53, %cst_27 {dimension_numbers = #tpu.dot_dimension_numbers<[1], [0], [0], [1], [0, 0, 1, 1], [], []>} : vector<64x128xf32>, vector<128x16xf32>, vector<64x16xf32> -> vector<64x16xf32>
    %c3 = arith.constant 3 : index
    %c0_28 = arith.constant 0 : index
    %c0_29 = arith.constant 0 : index
    %56 = vector.load %arg4[%c3, %c0_28, %c0_29] : memref<11x128x1xf32, #tpu.memory_space<vmem>>, vector<1x64x1xf32>
    %57 = vector.shape_cast %56 : vector<1x64x1xf32> to vector<64x1xf32>
    %58 = vector.broadcast %57 : vector<64x1xf32> to vector<64x16xf32>
    %59 = arith.addf %55, %58 : vector<64x16xf32>
    %60 = tpu.iota {dimensions = array<i32: 0>} : vector<16x256xi32>
    %61 = tpu.iota {dimensions = array<i32: 1>} : vector<16x256xi32>
    %c16_i32 = arith.constant 16 : i32
    %62 = vector.broadcast %c16_i32 : i32 to vector<16x256xi32>
    %63 = arith.muli %60, %62 : vector<16x256xi32>
    %64 = arith.cmpi sge, %61, %63 : vector<16x256xi32>
    %c1_i32_30 = arith.constant 1 : i32
    %65 = vector.broadcast %c1_i32_30 : i32 to vector<16x256xi32>
    %66 = arith.addi %60, %65 : vector<16x256xi32>
    %c16_i32_31 = arith.constant 16 : i32
    %67 = vector.broadcast %c16_i32_31 : i32 to vector<16x256xi32>
    %68 = arith.muli %66, %67 : vector<16x256xi32>
    %69 = arith.cmpi slt, %61, %68 : vector<16x256xi32>
    %70 = arith.andi %64, %69 : vector<16x256xi1>
    %cst_32 = arith.constant 1.000000e+00 : f32
    %cst_33 = arith.constant 0.000000e+00 : f32
    %71 = vector.broadcast %cst_32 : f32 to vector<16x256xf32>
    %72 = vector.broadcast %cst_33 : f32 to vector<16x256xf32>
    %73 = arith.select %70, %71, %72 : vector<16x256xi1>, vector<16x256xf32>
    %cst_34 = arith.constant dense<0.000000e+00> : vector<64x256xf32>
    %74 = tpu.matmul %59, %73, %cst_34 {dimension_numbers = #tpu.dot_dimension_numbers<[1], [0], [0], [1], [0, 0, 1, 1], [], []>} : vector<64x16xf32>, vector<16x256xf32>, vector<64x256xf32> -> vector<64x256xf32>
    %c10 = arith.constant 10 : index
    %c0_35 = arith.constant 0 : index
    %c0_36 = arith.constant 0 : index
    %75 = vector.load %arg4[%c10, %c0_35, %c0_36] : memref<11x128x1xf32, #tpu.memory_space<vmem>>, vector<1x64x1xf32>
    %76 = vector.shape_cast %75 : vector<1x64x1xf32> to vector<64x1xf32>
    %77 = vector.broadcast %76 : vector<64x1xf32> to vector<64x256xf32>
    %78 = vector.broadcast %6 : vector<1x256xf32> to vector<64x256xf32>
    %79 = arith.mulf %77, %78 : vector<64x256xf32>
    %80 = arith.addf %74, %79 : vector<64x256xf32>
    %cst_37 = arith.constant 0.000000e+00 : f32
    %81 = vector.broadcast %cst_37 : f32 to vector<64x256xf32>
    %82 = arith.maximumf %80, %81 : vector<64x256xf32>
    %c224 = arith.constant 224 : index
    %c0_38 = arith.constant 0 : index
    %83 = vector.load %arg3[%c224, %c0_38] : memref<288x128xf32, #tpu.memory_space<vmem>>, vector<32x64xf32>
    %cst_39 = arith.constant dense<0.000000e+00> : vector<32x256xf32>
    %84 = tpu.matmul %83, %82, %cst_39 {dimension_numbers = #tpu.dot_dimension_numbers<[1], [0], [0], [1], [0, 0, 1, 1], [], []>} : vector<32x64xf32>, vector<64x256xf32>, vector<32x256xf32> -> vector<32x256xf32>
    %c4 = arith.constant 4 : index
    %c0_40 = arith.constant 0 : index
    %c0_41 = arith.constant 0 : index
    %85 = vector.load %arg4[%c4, %c0_40, %c0_41] : memref<11x128x1xf32, #tpu.memory_space<vmem>>, vector<1x32x1xf32>
    %86 = vector.shape_cast %85 : vector<1x32x1xf32> to vector<32x1xf32>
    %87 = vector.broadcast %86 : vector<32x1xf32> to vector<32x256xf32>
    %88 = arith.addf %84, %87 : vector<32x256xf32>
    %cst_42 = arith.constant 0.000000e+00 : f32
    %89 = vector.broadcast %cst_42 : f32 to vector<32x256xf32>
    %90 = arith.maximumf %88, %89 : vector<32x256xf32>
    %c256 = arith.constant 256 : index
    %c0_43 = arith.constant 0 : index
    %91 = vector.load %arg3[%c256, %c0_43] : memref<288x128xf32, #tpu.memory_space<vmem>>, vector<16x32xf32>
    %cst_44 = arith.constant dense<0.000000e+00> : vector<16x256xf32>
    %92 = tpu.matmul %91, %90, %cst_44 {dimension_numbers = #tpu.dot_dimension_numbers<[1], [0], [0], [1], [0, 0, 1, 1], [], []>} : vector<16x32xf32>, vector<32x256xf32>, vector<16x256xf32> -> vector<16x256xf32>
    %c5 = arith.constant 5 : index
    %c0_45 = arith.constant 0 : index
    %c0_46 = arith.constant 0 : index
    %93 = vector.load %arg4[%c5, %c0_45, %c0_46] : memref<11x128x1xf32, #tpu.memory_space<vmem>>, vector<1x16x1xf32>
    %94 = vector.shape_cast %93 : vector<1x16x1xf32> to vector<16x1xf32>
    %95 = vector.broadcast %94 : vector<16x1xf32> to vector<16x256xf32>
    %96 = arith.addf %92, %95 : vector<16x256xf32>
    %cst_47 = arith.constant 0.000000e+00 : f32
    %97 = vector.broadcast %cst_47 : f32 to vector<16x256xf32>
    %98 = arith.maximumf %96, %97 : vector<16x256xf32>
    %c272 = arith.constant 272 : index
    %c0_48 = arith.constant 0 : index
    %99 = vector.load %arg3[%c272, %c0_48] : memref<288x128xf32, #tpu.memory_space<vmem>>, vector<8x16xf32>
    %cst_49 = arith.constant dense<0.000000e+00> : vector<8x256xf32>
    %100 = tpu.matmul %99, %98, %cst_49 {dimension_numbers = #tpu.dot_dimension_numbers<[1], [0], [0], [1], [0, 0, 1, 1], [], []>} : vector<8x16xf32>, vector<16x256xf32>, vector<8x256xf32> -> vector<8x256xf32>
    %c6 = arith.constant 6 : index
    %c0_50 = arith.constant 0 : index
    %c0_51 = arith.constant 0 : index
    %101 = vector.load %arg4[%c6, %c0_50, %c0_51] : memref<11x128x1xf32, #tpu.memory_space<vmem>>, vector<1x8x1xf32>
    %102 = vector.shape_cast %101 : vector<1x8x1xf32> to vector<8x1xf32>
    %103 = vector.broadcast %102 : vector<8x1xf32> to vector<8x256xf32>
    %104 = arith.addf %100, %103 : vector<8x256xf32>
    %cst_52 = arith.constant 0.000000e+00 : f32
    %105 = vector.broadcast %cst_52 : f32 to vector<8x256xf32>
    %106 = arith.maximumf %104, %105 : vector<8x256xf32>
    %c280 = arith.constant 280 : index
    %c0_53 = arith.constant 0 : index
    %107 = vector.load %arg3[%c280, %c0_53] : memref<288x128xf32, #tpu.memory_space<vmem>>, vector<2x8xf32>
    %cst_54 = arith.constant dense<0.000000e+00> : vector<2x256xf32>
    %108 = tpu.matmul %107, %106, %cst_54 {dimension_numbers = #tpu.dot_dimension_numbers<[1], [0], [0], [1], [0, 0, 1, 1], [], []>} : vector<2x8xf32>, vector<8x256xf32>, vector<2x256xf32> -> vector<2x256xf32>
    %c7 = arith.constant 7 : index
    %c0_55 = arith.constant 0 : index
    %c0_56 = arith.constant 0 : index
    %109 = vector.load %arg4[%c7, %c0_55, %c0_56] : memref<11x128x1xf32, #tpu.memory_space<vmem>>, vector<1x2x1xf32>
    %110 = vector.shape_cast %109 : vector<1x2x1xf32> to vector<2x1xf32>
    %111 = vector.broadcast %110 : vector<2x1xf32> to vector<2x256xf32>
    %112 = arith.addf %108, %111 : vector<2x256xf32>
    %113 = vector.extract_strided_slice %112 {offsets = [0, 0], sizes = [1, 256], strides = [1, 1]} : vector<2x256xf32> to vector<1x256xf32>
    %114 = vector.extract_strided_slice %112 {offsets = [1, 0], sizes = [1, 256], strides = [1, 1]} : vector<2x256xf32> to vector<1x256xf32>
    %cst_57 = arith.constant 2.000000e+01 : f32
    %115 = vector.broadcast %cst_57 : f32 to vector<1x256xf32>
    %116 = arith.cmpf ogt, %114, %115 : vector<1x256xf32>
    %cst_58 = arith.constant 2.000000e+01 : f32
    %117 = vector.broadcast %cst_58 : f32 to vector<1x256xf32>
    %118 = arith.minimumf %114, %117 : vector<1x256xf32>
    %119 = math.exp %118 : vector<1x256xf32>
    %120 = math.log1p %119 : vector<1x256xf32>
    %121 = arith.select %116, %114, %120 : vector<1x256xi1>, vector<1x256xf32>
    %cst_59 = arith.constant 1.000000e+00 : f32
    %122 = vector.broadcast %cst_59 : f32 to vector<1x256xf32>
    %123 = arith.divf %122, %121 : vector<1x256xf32>
    %124 = arith.subf %7, %113 : vector<1x256xf32>
    %125 = arith.mulf %124, %123 : vector<1x256xf32>
    %126 = math.log %121 : vector<1x256xf32>
    %cst_60 = arith.constant -0.918938517 : f32
    %127 = vector.broadcast %cst_60 : f32 to vector<1x256xf32>
    %128 = arith.subf %127, %126 : vector<1x256xf32>
    %cst_61 = arith.constant 5.000000e-01 : f32
    %129 = vector.broadcast %cst_61 : f32 to vector<1x256xf32>
    %130 = arith.mulf %129, %125 : vector<1x256xf32>
    %131 = arith.mulf %130, %125 : vector<1x256xf32>
    %132 = arith.subf %128, %131 : vector<1x256xf32>
    %133 = tpu.concatenate %113, %121, %132 in 0 : vector<1x256xf32>, vector<1x256xf32>, vector<1x256xf32> -> vector<3x256xf32>
    %c0_62 = arith.constant 0 : index
    %c0_63 = arith.constant 0 : index
    %c0_64 = arith.constant 0 : index
    %134 = vector.load %arg5[%c0_62, %c0_63, %c0_64] : memref<1x3x256xf32, #tpu.memory_space<vmem>>, vector<1x3x256xf32>
    %135 = vector.shape_cast %134 : vector<1x3x256xf32> to vector<3x256xf32>
    %136 = vector.shape_cast %133 : vector<3x256xf32> to vector<1x3x256xf32>
    tpu.vector_store %arg5[%c0_62, %c0_63, %c0_64], %136 {strides = array<i32>} : memref<1x3x256xf32, #tpu.memory_space<vmem>>, vector<1x3x256xf32>,
    return
  }
  func.func @transform_0(%arg0: i32) -> (i32, i32, i32) {
    %c0_i32 = arith.constant 0 : i32
    %c0_i32_0 = arith.constant 0 : i32
    %c0_i32_1 = arith.constant 0 : i32
    return %arg0, %c0_i32, %c0_i32_0 : i32, i32, i32
  }
  func.func @transform_1(%arg0: i32) -> (i32, i32, i32) {
    %c0_i32 = arith.constant 0 : i32
    %c0_i32_0 = arith.constant 0 : i32
    %c0_i32_1 = arith.constant 0 : i32
    return %arg0, %c0_i32, %c0_i32_0 : i32, i32, i32
  }
  func.func @transform_2(%arg0: i32) -> (i32, i32) {
    %c0_i32 = arith.constant 0 : i32
    %c0_i32_0 = arith.constant 0 : i32
    %c0_i32_1 = arith.constant 0 : i32
    return %c0_i32, %c0_i32_0 : i32, i32
  }
  func.func @transform_3(%arg0: i32) -> (i32, i32, i32) {
    %c0_i32 = arith.constant 0 : i32
    %c0_i32_0 = arith.constant 0 : i32
    %c0_i32_1 = arith.constant 0 : i32
    %c0_i32_2 = arith.constant 0 : i32
    return %c0_i32, %c0_i32_0, %c0_i32_1 : i32, i32, i32
  }
  func.func @transform_4(%arg0: i32) -> (i32, i32, i32) {
    %c0_i32 = arith.constant 0 : i32
    %c0_i32_0 = arith.constant 0 : i32
    %c0_i32_1 = arith.constant 0 : i32
    return %arg0, %c0_i32, %c0_i32_0 : i32, i32, i32
  }
}

</mosaic_0001>

<bundles_post_ra>
// kernel: tpu_custom_call.1
= control target key start
LH: loop header
LB: loop body
LE: loop exit
PB: predicated region body
PF: predicated region fallthrough
CT: control target
= control target key end

     0   :  { %s2421_s15 = smov 0   ;;  %s2937_s0 = inlined_call_operand.vmem [shape: f32[2,2,128], index: 0, kind: input, shape index: {}]   ;;  %s2938_s1 = inlined_call_operand.vmem [shape: f32[2,2,256], index: 1, kind: input, shape index: {}]   ;;  %s2939_s2 = inlined_call_operand.vmem [shape: f32[288,128], index: 2, kind: input, shape index: {}]   ;;  %s2940_s3 = inlined_call_operand.vmem [shape: f32[11,128,1], index: 3, kind: input, shape index: {}]   ;;  %s2941_s4 = inlined_call_operand.vmem [shape: f32[2,3,256], index: 4, kind: output, shape index: {}]  }
   0x1 LB: > { %s1911_s16 = sadd.s32 4294967295, %s2389_s15   ;;  %p1915_p0 = scmp.ge.s32.totalorder %s2389_s15, 1  ;;  %s2389_s15 = sphi %s2421_s15, %s14_s15  }
   0x2   : > { %p171_p1 = scmp.lt.s32.totalorder %s2389_s15, 3 }
   0x4   : > { %p172_p2 = pnand %p1915_p0, %p171_p1 }
   0x5   : > { %v242_v0 = vld [vmem:[%s2940_s3] sm:$0xff] (!%p172_p2)  ;;  %v2391_v2 = vmov (!%p172_p2), 0   ;;  %v1925_v5 = vld [vmem:[%s2940_s3 + $0x90] sm:$0xff] (!%p172_p2)  ;;  %v1924_v6 = vld [vmem:[%s2940_s3 + $0x88] sm:$0xff] (!%p172_p2)  ;;  %vm2942_vm0 = vcmask (!%p172_p2), 64512   ;;  %p201_p3 = scmp.lt.s32.totalorder (!%p172_p2), %s1911_s16, 1  ;;  %v224_v49 = vlaneseq (!%p172_p2) }
   0x6   : > { %175 = sbr.rel (%p172_p2) target bundleno = 2264 (0x8d8), region = 36  ;;  %v1921_v1 = vld [vmem:[%s2940_s3 + $0x400] sm:$0xff] (!%p172_p2)  ;;  %2366 = vset.pattern.permute.xlu1 (!%p172_p2), %v2391_v2  ;;  %2365 = vset.pattern.permute.xlu0 (!%p172_p2), %v2391_v2  ;;  %v1926_v8 = vld [vmem:[%s2940_s3 + $0x98] sm:$0xff] (!%p172_p2)  ;;  %v1933_v9 = vld [vmem:[%s2940_s3 + $0x110] sm:$0xff] (!%p172_p2)  ;;  %vm2943_vm1 = vcmask (!%p172_p2), 261120  }
   0x7   : > { %245 = vperm.xlu1 (!%p172_p2), %2366, %v242_v0   ;;  %221 = vperm.xlu0 (!%p172_p2), %2365, %v1921_v1   ;;  %v1923_v3 = vld [vmem:[%s2940_s3 + $0x80] sm:$0xff] (!%p172_p2)  ;;  %v1932_v10 = vld [vmem:[%s2940_s3 + $0x108] sm:$0xff] (!%p172_p2)  ;;  %v1934_v13 = vld [vmem:[%s2940_s3 + $0x118] sm:$0xff] (!%p172_p2)  ;;  %v2581_v50 = vshrl.u32 (!%p172_p2), %v224_v49, 7 }
   0x8   : > { %v1922_v4 = vld [vmem:[%s2940_s3 + $0x480] sm:$0xff] (!%p172_p2)  ;;  %v1937_v14 = vld [vmem:[%s2940_s3 + $0x130] sm:$0xff] (!%p172_p2)  ;;  %v1936_v15 = vld [vmem:[%s2940_s3 + $0x128] sm:$0xff] (!%p172_p2) }
   0x9   : > { %v1931_v7 = vld [vmem:[%s2940_s3 + $0x100] sm:$0xff] (!%p172_p2)  ;;  %v1938_v17 = vld [vmem:[%s2940_s3 + $0x138] sm:$0xff] (!%p172_p2)  ;;  %v1941_v18 = vld [vmem:[%s2940_s3 + $0x150] sm:$0xff] (!%p172_p2)  ;;  %v2587_v51 = vsub.s32 (!%p172_p2), 0, %v2581_v50  ;;  %v238_v52 = vsub.s32 (!%p172_p2), 1, %v2581_v50 }
   0xa   : > { %v250_v11 = vld [vmem:[%s2939_s2] sm:$0xff] (!%p172_p2)  ;;  %v1940_v19 = vld [vmem:[%s2940_s3 + $0x148] sm:$0xff] (!%p172_p2)  ;;  %v1942_v21 = vld [vmem:[%s2940_s3 + $0x158] sm:$0xff] (!%p172_p2) }
   0xb   : > { %261 = vperm.xlu1 (!%p172_p2), %2366, %v1923_v3   ;;  %233 = vperm.xlu0 (!%p172_p2), %2365, %v1922_v4   ;;  %v1935_v12 = vld [vmem:[%s2940_s3 + $0x120] sm:$0xff] (!%p172_p2)  ;;  %v1945_v22 = vld [vmem:[%s2940_s3 + $0x170] sm:$0xff] (!%p172_p2)  ;;  %v1944_v23 = vld [vmem:[%s2940_s3 + $0x168] sm:$0xff] (!%p172_p2)  ;;  %v2609_v4 = vand.u32 (!%p172_p2), 127, %v224_v49 }
   0xc   : > { %2110 = vmatprep.mubr.msk.f32.mxu0 (!%p172_p2), %vm2942_vm0, %v250_v11  ;;  %v1939_v16 = vld [vmem:[%s2940_s3 + $0x140] sm:$0xff] (!%p172_p2)  ;;  %v1946_v25 = vld [vmem:[%s2940_s3 + $0x178] sm:$0xff] (!%p172_p2)  ;;  %v1981_v26 = vld [vmem:[%s2940_s3 + $0x190] sm:$0xff] (!%p172_p2)  ;;  %v693_v11 = vadd.s32 (!%p172_p2), 32, %v2581_v50 }
   0xd   : > { %v1943_v20 = vld [vmem:[%s2940_s3 + $0x160] sm:$0xff]  ;;  %v1980_v27 = vld [vmem:[%s2940_s3 + $0x188] sm:$0xff]  ;;  %v1982_v29 = vld [vmem:[%s2940_s3 + $0x198] sm:$0xff]  ;;  %s2979_s16 = smov (!%p201_p3, %s1911_s16), 1 }
   0xe   : > { %v1979_v24 = vld [vmem:[%s2940_s3 + $0x180] sm:$0xff]  ;;  %v1985_v30 = vld [vmem:[%s2940_s3 + $0x1b0] sm:$0xff]  ;;  %v1984_v31 = vld [vmem:[%s2940_s3 + $0x1a8] sm:$0xff]  ;;  %s1916_s17 = sshll.u32 %s2979_s16, 1  ;;  %s2025_s27 = sshll.u32 %s2979_s16, 2 }
   0xf   : > { %271 = vperm.xlu1 %2366, %v1925_v5   ;;  %266 = vperm.xlu0 %2365, %v1924_v6   ;;  %v1983_v28 = vld [vmem:[%s2940_s3 + $0x1a0] sm:$0xff]  ;;  %v1986_v33 = vld [vmem:[%s2940_s3 + $0x1b8] sm:$0xff]  ;;  %v1989_v34 = vld [vmem:[%s2940_s3 + $0x510] sm:$0xff]  ;;  %s204_s20 = scalar_lea.vmem %s2937_s0, %s1916_s17  ;;  %v2612_v5 = vadd.s32 8, %v2581_v50  ;;  %v2615_v6 = vmul.u32 8, %v2609_v4  ;;  %s209_s30 = scalar_lea.vmem %s2938_s1, %s2025_s27 }
  0x10   : > { %v1987_v32 = vld [vmem:[%s2940_s3 + $0x500] sm:$0xff]  ;;  %v1988_v35 = vld [vmem:[%s2940_s3 + $0x508] sm:$0xff]  ;;  %v1990_v37 = vld [vmem:[%s2940_s3 + $0x518] sm:$0xff]  ;;  %s2026_s23 = sshll.u32 %s2979_s16, 3 }
  0x11   : > { %v1991_v36 = vld [vmem:[%s2940_s3 + $0x520] sm:$0xff]  ;;  %v1993_v38 = vld [vmem:[%s2940_s3 + $0x530] sm:$0xff]  ;;  %v1992_v39 = vld [vmem:[%s2940_s3 + $0x528] sm:$0xff]  ;;  %vm708_vm2 = vcmp.ge.s32.totalorder %v2581_v50, %v2615_v6  ;;  %vm709_vm3 = vcmp.ge.s32.totalorder %v2612_v5, %v2615_v6  ;;  %vm712_vm14 = vcmp.ge.s32.totalorder %v693_v11, %v2615_v6  ;;  %s214_s26 = scalar_lea.vmem %s2941_s4, %s2026_s23 }
  0x12   : > { %v2007_v40 = vld [vmem:[%s2940_s3 + $0x200] sm:$0xff]  ;;  %v1994_v41 = vld [vmem:[%s2940_s3 + $0x538] sm:$0xff]  ;;  %v2009_v42 = vld [vmem:[%s2940_s3 + $0x210] sm:$0xff] }
  0x13   : > { %416 = vperm.xlu1 %2366, %v1931_v7   ;;  %276 = vperm.xlu0 %2365, %v1926_v8   ;;  %v2008_v43 = vld [vmem:[%s2940_s3 + $0x208] sm:$0xff]  ;;  %v2015_v44 = vld [vmem:[%s2940_s3 + $0x280] sm:$0xff]  ;;  %v2010_v45 = vld [vmem:[%s2940_s3 + $0x218] sm:$0xff]  ;;  %v724_v7 = vadd.s32 1, %v2609_v4  ;;  %v691_v8 = vadd.s32 16, %v2581_v50 }
  0x14   : > { %v2019_v46 = vld [vmem:[%s2940_s3 + $0x300] sm:$0xff]  ;;  %v2016_v47 = vld [vmem:[%s2940_s3 + $0x288] sm:$0xff]  ;;  %v252_v1 = vld [vmem:[%s2939_s2 + $0x10] sm:$0xff] }
  0x15   : > { %v2021_v48 = vld [vmem:[%s2940_s3 + $0x380] sm:$0x3]  ;;  %v251_v0 = vld [vmem:[%s2939_s2 + $0x8] sm:$0xff]  ;;  %v253_v2 = vld [vmem:[%s2939_s2 + $0x18] sm:$0xff]  ;;  %vm710_vm7 = vcmp.ge.s32.totalorder %v691_v8, %v2615_v6 }
  0x16   : > { %v215_v53 = vld [vmem:[%s204_s20] sm:$0x3]  ;;  %v383_v49 = vld [vmem:[%s2939_s2 + $0x30] sm:$0xff] }
  0x17   : > { %426 = vperm.xlu1 %2366, %v1933_v9   ;;  %421 = vperm.xlu0 %2365, %v1932_v10   ;;  %v227_v55 = vrot.slane %v215_v53, %v2587_v51  ;;  %v239_v56 = vrot.slane %v215_v53, %v238_v52  ;;  %v381_v3 = vld [vmem:[%s2939_s2 + $0x20] sm:$0xff]  ;;  %v2621_v9 = vmul.u32 8, %v724_v7  ;;  %v692_v10 = vadd.s32 24, %v2581_v50  ;;  %v384_v53 = vld [vmem:[%s2939_s2 + $0x38] sm:$0xff] }
  0x18   : > { %2124 = vmatprep.mubr.msk.f32.mxu1 %vm2943_vm1, %v381_v3  ;;  %v704_v3 = vadd.s32 120, %v2581_v50 }
  0x19   : > { %vm726_vm4 = vcmp.lt.s32.totalorder %v2581_v50, %v2621_v9  ;;  %vm727_vm5 = vcmp.lt.s32.totalorder %v2612_v5, %v2621_v9  ;;  %vm728_vm8 = vcmp.lt.s32.totalorder %v691_v8, %v2621_v9  ;;  %vm711_vm10 = vcmp.ge.s32.totalorder %v692_v10, %v2615_v6 }
  0x1a   : > { %vm2631_vm6 = vmand %vm708_vm2, %vm726_vm4  ;;  %vm729_vm11 = vcmp.lt.s32.totalorder %v692_v10, %v2621_v9  ;;  %vm730_vm15 = vcmp.lt.s32.totalorder %v693_v11, %v2621_v9 }
  0x1b   : > { %436 = vperm.xlu1 %2366, %v1935_v12   ;;  %431 = vperm.xlu0 %2365, %v1934_v13   ;;  %v694_v13 = vadd.s32 40, %v2581_v50  ;;  %vm743_vm9 = vmand %vm709_vm3, %vm727_vm5 }
  0x1c   : > { %vm2256_vm12 = vmpackc.low %vm743_vm9, %vm2631_vm6 }
  0x1d   : > { %vm2644_vm13 = vmand %vm710_vm7, %vm728_vm8  ;;  %vm713_vm3 = vcmp.ge.s32.totalorder %v694_v13, %v2615_v6  ;;  %vm731_vm4 = vcmp.lt.s32.totalorder %v694_v13, %v2621_v9 }
  0x1e   : > { %vm745_vm2 = vmand %vm711_vm10, %vm729_vm11 }
  0x1f   : > { %446 = vperm.xlu1 %2366, %v1937_v14   ;;  %441 = vperm.xlu0 %2365, %v1936_v15   ;;  %v695_v14 = vadd.s32 48, %v2581_v50  ;;  %v2392_v15 = vmov 0.125|0.125   ;;  %vm2260_vm5 = vmpackc.low %vm745_vm2, %vm2644_vm13 }
  0x20   : > { %vm2658_vm6 = vmand %vm712_vm14, %vm730_vm15 }
  0x21   : > { %vm714_vm7 = vcmp.ge.s32.totalorder %v695_v14, %v2615_v6  ;;  %vm732_vm8 = vcmp.lt.s32.totalorder %v695_v14, %v2621_v9  ;;  %vm2665_vm9 = vmand %vm713_vm3, %vm731_vm4 }
  0x22   : > { %vm2678_vm13 = vmand %vm714_vm7, %vm732_vm8 }
  0x23   : > { %456 = vperm.xlu1 %2366, %v1939_v16   ;;  %451 = vperm.xlu0 %2365, %v1938_v17   ;;  %v696_v17 = vadd.s32 56, %v2581_v50 }
  0x25   : > { %vm715_vm10 = vcmp.ge.s32.totalorder %v696_v17, %v2615_v6  ;;  %vm733_vm11 = vcmp.lt.s32.totalorder %v696_v17, %v2621_v9 }
  0x26   : > { %vm2685_vm2 = vmand %vm715_vm10, %vm733_vm11 }
  0x27   : > { %466 = vperm.xlu1 %2366, %v1941_v18   ;;  %461 = vperm.xlu0 %2365, %v1940_v19   ;;  %v697_v18 = vadd.s32 64, %v2581_v50 }
  0x29   : > { %vm716_vm14 = vcmp.ge.s32.totalorder %v697_v18, %v2615_v6  ;;  %vm734_vm15 = vcmp.lt.s32.totalorder %v697_v18, %v2621_v9 }
  0x2b   : > { %476 = vperm.xlu1 %2366, %v1943_v20   ;;  %471 = vperm.xlu0 %2365, %v1942_v21   ;;  %v698_v20 = vadd.s32 72, %v2581_v50 }
  0x2d   : > { %vm717_vm3 = vcmp.ge.s32.totalorder %v698_v20, %v2615_v6  ;;  %vm735_vm4 = vcmp.lt.s32.totalorder %v698_v20, %v2621_v9 }
  0x2f   : > { %486 = vperm.xlu1 %2366, %v1945_v22   ;;  %481 = vperm.xlu0 %2365, %v1944_v23   ;;  %v699_v22 = vadd.s32 80, %v2581_v50 }
  0x31   : > { %vm718_vm7 = vcmp.ge.s32.totalorder %v699_v22, %v2615_v6  ;;  %vm736_vm8 = vcmp.lt.s32.totalorder %v699_v22, %v2621_v9 }
  0x33   : > { %938 = vperm.xlu1 %2366, %v1979_v24   ;;  %491 = vperm.xlu0 %2365, %v1946_v25   ;;  %v700_v24 = vadd.s32 88, %v2581_v50 }
  0x35   : > { %vm719_vm10 = vcmp.ge.s32.totalorder %v700_v24, %v2615_v6  ;;  %vm737_vm11 = vcmp.lt.s32.totalorder %v700_v24, %v2621_v9 }
  0x37   : > { %948 = vperm.xlu1 %2366, %v1981_v26   ;;  %943 = vperm.xlu0 %2365, %v1980_v27   ;;  %v701_v26 = vadd.s32 96, %v2581_v50 }
  0x3b   : > { %958 = vperm.xlu1 %2366, %v1983_v28   ;;  %953 = vperm.xlu0 %2365, %v1982_v29   ;;  %v702_v28 = vadd.s32 104, %v2581_v50 }
  0x3f   : > { %968 = vperm.xlu1 %2366, %v1985_v30   ;;  %963 = vperm.xlu0 %2365, %v1984_v31  }
  0x43   : > { %1115 = vperm.xlu1 %2366, %v1987_v32   ;;  %973 = vperm.xlu0 %2365, %v1986_v33  }
  0x47   : > { %1125 = vperm.xlu1 %2366, %v1989_v34   ;;  %1120 = vperm.xlu0 %2365, %v1988_v35  }
  0x4b   : > { %1135 = vperm.xlu1 %2366, %v1991_v36   ;;  %1130 = vperm.xlu0 %2365, %v1990_v37  }
  0x4f   : > { %1145 = vperm.xlu1 %2366, %v1993_v38   ;;  %1140 = vperm.xlu0 %2365, %v1992_v39  }
  0x53   : > { %1353 = vperm.xlu1 %2366, %v2007_v40   ;;  %1150 = vperm.xlu0 %2365, %v1994_v41  }
  0x57   : > { %1363 = vperm.xlu1 %2366, %v2009_v42   ;;  %1358 = vperm.xlu0 %2365, %v2008_v43  }
  0x5b   : > { %1488 = vperm.xlu1 %2366, %v2015_v44   ;;  %1368 = vperm.xlu0 %2365, %v2010_v45  }
  0x5f   : > { %1588 = vperm.xlu1 %2366, %v2019_v46   ;;  %1493 = vperm.xlu0 %2365, %v2016_v47  }
  0x63   : > { %1672 = vperm.xlu0 %2365, %v2021_v48   ;;  %v382_v48 = vld [vmem:[%s2939_s2 + $0x28] sm:$0xff] }
  0x86   : > { %v222_v54 = vpop.permute.xlu0 %221  ;;  %v246_v61 = vpop.permute.xlu1 %245 }
  0x87   : > { %v228_v58 = vmul.f32 %v227_v55, %v222_v54  ;;  %v385_v54 = vld [vmem:[%s2939_s2 + $0x40] sm:$0xff]  ;;  %v386_v55 = vld [vmem:[%s2939_s2 + $0x48] sm:$0xff] }
  0x8a   : > { %v234_v57 = vpop.permute.xlu0 %233  ;;  %v262_v31 = vpop.permute.xlu1 %261 }
  0x8b   : > { %v240_v59 = vmul.f32 %v239_v56, %v234_v57  ;;  %v387_v56 = vld [vmem:[%s2939_s2 + $0x50] sm:$0xff]  ;;  %v388_v57 = vld [vmem:[%s2939_s2 + $0x58] sm:$0xff] }
  0x8d   : > { %v241_v60 = vadd.f32 %v240_v59, %v228_v58  ;;  %v389_v58 = vld [vmem:[%s2939_s2 + $0x60] sm:$0xff]  ;;  %v390_v59 = vld [vmem:[%s2939_s2 + $0x68] sm:$0xff] }
  0x8e   : > { %v267_v30 = vpop.permute.xlu0 %266  ;;  %v272_v40 = vpop.permute.xlu1 %271 }
  0x8f   : > { %v248_v62 = vadd.f32 %v246_v61, %v241_v60  ;;  %v391_v60 = vld [vmem:[%s2939_s2 + $0x70] sm:$0xff]  ;;  %v392_v61 = vld [vmem:[%s2939_s2 + $0x78] sm:$0xff] }
  0x91   : > { %v249_v63 = vmax.f32 %v248_v62, 0.0  ;;  %v393_v62 = vld [vmem:[%s2939_s2 + $0x80] sm:$0xff] }
  0x92   : > { %v277_v37 = vpop.permute.xlu0 %276  ;;  %v417_v7 = vpop.permute.xlu1 %416 }
  0x93   : > { %2108 = vmatprep.subr.mxu0 %v249_v63 }
  0x94   : > { %2109 = vmatpush3.msra.mxu0 %v249_v63  ;;  %v394_v63 = vld [vmem:[%s2939_s2 + $0x88] sm:$0xff] }
  0x95   : > { %2111 = vmatmul.mubr.msk.f32.vlgmr.msra.gmra.mrb[0].mxu0 %vm2942_vm0, %v251_v0  ;;  %2257 = vmatprep.subr.msk.bf16.mxu0 %vm2256_vm12, %v2392_v15  ;;  %v395_v0 = vld [vmem:[%s2939_s2 + $0x90] sm:$0xff] }
  0x96   : > { %2113 = vmatprep.mubr.msk.f32.mxu0 %vm2942_vm0, %v252_v1  ;;  %2259 = vmatpush3.bf16.msk.msra.mxu0 %vm2256_vm12, %v2392_v15  ;;  %vm2264_vm12 = vmpackc.low %vm2665_vm9, %vm2658_vm6  ;;  %v396_v1 = vld [vmem:[%s2939_s2 + $0x98] sm:$0xff]  ;;  %v422_v8 = vpop.permute.xlu0 %421  ;;  %v427_v10 = vpop.permute.xlu1 %426 }
  0x97   : > { %2261 = vmatprep.subr.msk.bf16.mxu0 %vm2260_vm5, %v2392_v15  ;;  %vm2697_vm6 = vmand %vm716_vm14, %vm734_vm15  ;;  %vm720_vm14 = vcmp.ge.s32.totalorder %v701_v26, %v2615_v6  ;;  %vm738_vm15 = vcmp.lt.s32.totalorder %v701_v26, %v2621_v9 }
  0x98   : > { %vm2705_vm9 = vmand %vm717_vm3, %vm735_vm4  ;;  %vm721_vm3 = vcmp.ge.s32.totalorder %v702_v28, %v2615_v6  ;;  %vm739_vm4 = vcmp.lt.s32.totalorder %v702_v28, %v2621_v9 }
  0x99   : > { %2114 = vmatmul.mubr.msk.f32.gmra.mrb[2].mxu0 %vm2942_vm0, %v253_v2  ;;  %vm754_vm1 = vmand %vm720_vm14, %vm738_vm15  ;;  %v703_v2 = vadd.s32 112, %v2581_v50 }
  0x9a   : > { %2263 = vmatpush3.bf16.msk.msra.mxu0 %vm2260_vm5, %v2392_v15  ;;  %vm2268_vm5 = vmpackc.low %vm2685_vm2, %vm2678_vm13  ;;  %v432_v11 = vpop.permute.xlu0 %431  ;;  %v437_v12 = vpop.permute.xlu1 %436 }
  0x9b   : > { %2265 = vmatprep.subr.msk.bf16.mxu0 %vm2264_vm12, %v2392_v15  ;;  %vm752_vm13 = vmand %vm718_vm7, %vm736_vm8 }
  0x9c   : > { %vm753_vm2 = vmand %vm719_vm10, %vm737_vm11 }
  0x9d   : > { %vm2276_vm0 = vmpackc.low %vm753_vm2, %vm752_vm13 }
  0x9e   : > { %2267 = vmatpush3.bf16.msk.msra.mxu0 %vm2264_vm12, %v2392_v15  ;;  %vm2272_vm12 = vmpackc.low %vm2705_vm9, %vm2697_vm6  ;;  %v442_v13 = vpop.permute.xlu0 %441 }
  0x9f   : > { %2269 = vmatprep.subr.msk.bf16.mxu0 %vm2268_vm5, %v2392_v15  ;;  %vm755_vm6 = vmand %vm721_vm3, %vm739_vm4 }
  0xa0   : > { %vm2280_vm7 = vmpackc.low %vm755_vm6, %vm754_vm1 }
  0xa2   : > { %2271 = vmatpush3.bf16.msk.msra.mxu0 %vm2268_vm5, %v2392_v15  ;;  %v452_v20 = vpop.permute.xlu0 %451 }
  0xa3   : > { %2273 = vmatprep.subr.msk.bf16.mxu0 %vm2272_vm12, %v2392_v15 }
  0xa6   : > { %2275 = vmatpush3.bf16.msk.msra.mxu0 %vm2272_vm12, %v2392_v15  ;;  %v462_v27 = vpop.permute.xlu0 %461 }
  0xa7   : > { %2277 = vmatprep.subr.msk.bf16.mxu0 %vm2276_vm0, %v2392_v15 }
  0xaa   : > { %2279 = vmatpush3.bf16.msk.msra.mxu0 %vm2276_vm0, %v2392_v15  ;;  %vm2960_vm0 = vcmask 261120  }
  0xab   : > { %2281 = vmatprep.subr.msk.bf16.mxu0 %vm2280_vm7, %v2392_v15  ;;  %vm2961_vm1 = vmmov %vm2960_vm0 }
  0xac   : > { %vm2962_vm5 = vmmov %vm2960_vm0 }
  0xad   : > { %vm2963_vm8 = vmmov %vm2960_vm0 }
  0xae   : > { %2283 = vmatpush3.bf16.msk.msra.mxu0 %vm2280_vm7, %v2392_v15  ;;  %vm2964_vm9 = vmmov %vm2960_vm0  ;;  %vm722_vm7 = vcmp.ge.s32.totalorder %v703_v2, %v2615_v6 }
  0xaf   : > { %vm2965_vm10 = vmmov %vm2960_vm0 }
  0xb0   : > { %vm2966_vm11 = vmmov %vm2960_vm0 }
  0xb1   : > { %vm2967_vm12 = vmmov %vm2960_vm0 }
  0xb2   : > { %vm2968_vm13 = vmmov %vm2960_vm0 }
  0xb3   : > { %vm2969_vm14 = vmmov %vm2960_vm0 }
  0xb4   : > { %vm2970_vm15 = vmmov %vm2960_vm0 }
  0xb5   : > { %vm2971_vm2 = vmmov %vm2960_vm0 }
  0xb6   : > { %vm2972_vm3 = vmmov %vm2960_vm0 }
  0xb7   : > { %vm2973_vm4 = vmmov %vm2960_vm0 }
  0xb8   : > { %vm2974_vm6 = vmmov %vm2960_vm0 }
 0x168   : > { %v2112_v32 = vpop.f32.mrb[0].mxu0 }
 0x169   : > { %v364_v33 = vadd.f32 %v2112_v32, %v267_v30  ;;  %v358_v34 = vpop.f32.mrb[1].mxu0 }
 0x16a   : > { %v359_v35 = vadd.f32 %v358_v34, %v262_v31 }
 0x16b   : > { %v378_v36 = vmax.f32 %v364_v33, 0.0 }
 0x16c   : > { %v377_v38 = vmax.f32 %v359_v35, 0.0  ;;  %v2115_v39 = vpop.f32.mrb[2].mxu0  ;;  %v472_v35 = vpop.permute.xlu0 %471 }
 0x16d   : > { %v374_v41 = vadd.f32 %v2115_v39, %v277_v37  ;;  %v368_v42 = vpop.f32.mrb[3].mxu0 }
 0x16e   : > { %v369_v43 = vadd.f32 %v368_v42, %v272_v40  ;;  %v2248_v44 = vpack.c.bf16 %v378_v36, %v377_v38 }
 0x16f   : > { %v380_v45 = vmax.f32 %v374_v41, 0.0 }
 0x170   : > { %v379_v46 = vmax.f32 %v369_v43, 0.0  ;;  %2249 = vmatprep.subr.bf16.mxu1 %v2248_v44  ;;  %v482_v43 = vpop.permute.xlu0 %481 }
 0x171   : > { %2251 = vmatpush3.bf16.msra.mxu1 %v2248_v44 }
 0x172   : > { %v2252_v47 = vpack.c.bf16 %v380_v45, %v379_v46 }
 0x174   : > { %2253 = vmatprep.subr.bf16.mxu1 %v2252_v47 }
 0x175   : > { %2255 = vmatpush3.bf16.msra.mxu1 %v2252_v47 }
 0x178   : > { %2125 = vmatmul.mubr.msk.f32.vlgmr.msra.gmra.mrb[0].mxu1 %vm2960_vm0, %v382_v48  ;;  %vm723_vm0 = vcmp.ge.s32.totalorder %v704_v3, %v2615_v6 }
 0x179   : > { %2127 = vmatprep.mubr.msk.f32.mxu1 %vm2961_vm1, %v383_v49  ;;  %vm740_vm1 = vcmp.lt.s32.totalorder %v703_v2, %v2621_v9 }
 0x17c   : > { %2128 = vmatmul.mubr.msk.f32.gmra.mrb[2].mxu1 %vm2962_vm5, %v384_v53  ;;  %vm741_vm5 = vcmp.lt.s32.totalorder %v704_v3, %v2621_v9  ;;  %v447_v9 = vpop.permute.xlu1 %446 }
 0x17d   : > { %2130 = vmatprep.mubr.msk.f32.mxu1 %vm2963_vm8, %v385_v54  ;;  %vm756_vm8 = vmand %vm722_vm7, %vm740_vm1  ;;  %v492_v54 = vpop.permute.xlu0 %491 }
 0x180   : > { %2131 = vmatmul.mubr.msk.f32.gmra.mrb[4].mxu1 %vm2964_vm9, %v386_v55  ;;  %vm757_vm9 = vmand %vm723_vm0, %vm741_vm5  ;;  %v457_v25 = vpop.permute.xlu1 %456 }
 0x181   : > { %2133 = vmatprep.mubr.msk.f32.mxu1 %vm2965_vm10, %v387_v56  ;;  %vm2284_vm10 = vmpackc.low %vm757_vm9, %vm756_vm8  ;;  %vm1188_vm9 = vcmask 130048  }
 0x182   : > { %2285 = vmatprep.subr.msk.bf16.mxu0 %vm2284_vm10, %v2392_v15 }
 0x183   : > { %2287 = vmatpush3.bf16.msk.msra.mxu0 %vm2284_vm10, %v2392_v15  ;;  %vm1371_vm10 = vcmask 523264  }
 0x184   : > { %2134 = vmatmul.mubr.msk.f32.gmra.mrb[6].mxu1 %vm2966_vm11, %v388_v57  ;;  %v467_v33 = vpop.permute.xlu1 %466  ;;  %v919_v57 = vld [vmem:[%s2939_s2 + $0xa0] sm:$0xff] }
 0x185   : > { %2136 = vmatprep.mubr.msk.f32.mxu1 %vm2967_vm12, %v389_v58 }
 0x188   : > { %2137 = vmatmul.mubr.msk.f32.gmra.mrb[8].mxu1 %vm2968_vm13, %v390_v59  ;;  %v477_v41 = vpop.permute.xlu1 %476 }
 0x189   : > { %2139 = vmatprep.mubr.msk.f32.mxu1 %vm2969_vm14, %v391_v60 }
 0x18c   : > { %2140 = vmatmul.mubr.msk.f32.gmra.mrb[10].mxu1 %vm2970_vm15, %v392_v61  ;;  %v487_v49 = vpop.permute.xlu1 %486 }
 0x18d   : > { %2142 = vmatprep.mubr.msk.f32.mxu1 %vm2971_vm2, %v393_v62 }
 0x190   : > { %2143 = vmatmul.mubr.msk.f32.gmra.mrb[12].mxu1 %vm2972_vm3, %v394_v63 }
 0x191   : > { %2145 = vmatprep.mubr.msk.f32.mxu1 %vm2973_vm4, %v395_v0 }
 0x194   : > { %2146 = vmatmul.mubr.msk.f32.gmra.mrb[14].mxu1 %vm2974_vm6, %v396_v1 }
 0x195   : > { %2236 = vmatprep.mubr.f32.mxu1 %v919_v57 }
 0x24b   : > { %v2126_v14 = vpop.f32.mrb[0].mxu1 }
 0x24c   : > { %v609_v16 = vpop.f32.mrb[1].mxu1  ;;  %v615_v17 = vadd.f32 %v2126_v14, %v422_v8 }
 0x24d   : > { %v610_v6 = vadd.f32 %v609_v16, %v417_v7 }
 0x24f   : > { %v2129_v18 = vpop.f32.mrb[2].mxu1  ;;  %2180 = vmatprep.mubr.f32.mxu0 %v610_v6 }
 0x250   : > { %v619_v19 = vpop.f32.mrb[3].mxu1  ;;  %2181 = vmatmul.mubr.f32.vlgmr.msra.gmra.mrb[4].mxu0 %v615_v17  ;;  %v625_v22 = vadd.f32 %v2129_v18, %v432_v11 }
 0x251   : > { %v620_v21 = vadd.f32 %v619_v19, %v427_v10 }
 0x253   : > { %v2132_v23 = vpop.f32.mrb[4].mxu1  ;;  %2183 = vmatprep.mubr.f32.mxu0 %v620_v21  ;;  %v920_v21 = vld [vmem:[%s2939_s2 + $0xa8] sm:$0xff] }
 0x254   : > { %v629_v15 = vpop.f32.mrb[5].mxu1  ;;  %2184 = vmatmul.mubr.f32.gmra.mrb[6].mxu0 %v625_v22  ;;  %v635_v26 = vadd.f32 %v2132_v23, %v442_v13  ;;  %v921_v22 = vld [vmem:[%s2939_s2 + $0xb0] sm:$0xff]  ;;  %v922_v23 = vld [vmem:[%s2939_s2 + $0xb8] sm:$0xff] }
 0x255   : > { %v630_v24 = vadd.f32 %v629_v15, %v437_v12  ;;  %v923_v15 = vld [vmem:[%s2939_s2 + $0xc0] sm:$0xff] }
 0x257   : > { %v2135_v28 = vpop.f32.mrb[6].mxu1  ;;  %2186 = vmatprep.mubr.f32.mxu0 %v630_v24  ;;  %v924_v24 = vld [vmem:[%s2939_s2 + $0xc8] sm:$0xff] }
 0x258   : > { %v639_v29 = vpop.f32.mrb[7].mxu1  ;;  %2187 = vmatmul.mubr.f32.gmra.mrb[8].mxu0 %v635_v26  ;;  %v645_v31 = vadd.f32 %v2135_v28, %v452_v20  ;;  %v926_v26 = vld [vmem:[%s2939_s2 + $0xd8] sm:$0xff]  ;;  %v1089_v28 = vadd.s32 1, %v2612_v5 }
 0x259   : > { %v640_v30 = vadd.f32 %v639_v29, %v447_v9  ;;  %v1081_v29 = vadd.s32 128, %v2609_v4 }
 0x25b   : > { %v2138_v32 = vpop.f32.mrb[8].mxu1  ;;  %2189 = vmatprep.mubr.f32.mxu0 %v640_v30  ;;  %v1082_v30 = vmul.u32 16, %v2581_v50 }
 0x25c   : > { %v649_v34 = vpop.f32.mrb[9].mxu1  ;;  %2190 = vmatmul.mubr.f32.gmra.mrb[10].mxu0 %v645_v31  ;;  %v655_v37 = vadd.f32 %v2138_v32, %v462_v27  ;;  %v1088_v27 = vadd.s32 1, %v2581_v50  ;;  %v1083_v31 = vmul.u32 16, %v2612_v5  ;;  %v2394_v5 = vmov 0.0  }
 0x25d   : > { %v650_v36 = vadd.f32 %v649_v34, %v457_v25  ;;  %v925_v25 = vld [vmem:[%s2939_s2 + $0xd0] sm:$0xff]  ;;  %vm1085_vm11 = vcmp.ge.s32.totalorder %v1081_v29, %v1082_v30  ;;  %vm1084_vm2 = vcmp.ge.s32.totalorder %v2609_v4, %v1082_v30  ;;  %v2393_v34 = vmov 1.0|1.0  }
 0x25e   : > { %v1090_v32 = vmul.u32 16, %v1088_v27  ;;  %vm1087_vm12 = vcmp.ge.s32.totalorder %v1081_v29, %v1083_v31  ;;  %vm1086_vm6 = vcmp.ge.s32.totalorder %v2609_v4, %v1083_v31 }
 0x25f   : > { %v2141_v38 = vpop.f32.mrb[10].mxu1  ;;  %2192 = vmatprep.mubr.f32.mxu0 %v650_v36  ;;  %v939_v36 = vpop.permute.xlu1 %938 }
 0x260   : > { %v659_v39 = vpop.f32.mrb[11].mxu1  ;;  %2193 = vmatmul.mubr.f32.gmra.mrb[12].mxu0 %v655_v37  ;;  %v665_v42 = vadd.f32 %v2141_v38, %v472_v35  ;;  %vm1093_vm13 = vcmp.lt.s32.totalorder %v1081_v29, %v1090_v32  ;;  %vm1092_vm3 = vcmp.lt.s32.totalorder %v2609_v4, %v1090_v32 }
 0x261   : > { %v660_v40 = vadd.f32 %v659_v39, %v467_v33  ;;  %v1091_v33 = vmul.u32 16, %v1089_v28  ;;  %vm1097_vm15 = vmand %vm1085_vm11, %vm1093_vm13  ;;  %vm2975_vm11 = vcmask 261120   ;;  %vm2977_vm13 = vcmask 64512  }
 0x262   : > { %vm1096_vm1 = vmand %vm1084_vm2, %vm1092_vm3 }
 0x263   : > { %v2144_v44 = vpop.f32.mrb[12].mxu1  ;;  %2195 = vmatprep.mubr.f32.mxu0 %v660_v40  ;;  %vm1095_vm14 = vcmp.lt.s32.totalorder %v1081_v29, %v1091_v33  ;;  %vm1094_vm7 = vcmp.lt.s32.totalorder %v2609_v4, %v1091_v33  ;;  %v944_v4 = vpop.permute.xlu0 %943 }
 0x264   : > { %v669_v45 = vpop.f32.mrb[13].mxu1  ;;  %2196 = vmatmul.mubr.f32.gmra.mrb[14].mxu0 %v665_v42  ;;  %v675_v47 = vadd.f32 %v2144_v44, %v482_v43  ;;  %vm1099_vm4 = vmand %vm1087_vm12, %vm1095_vm14  ;;  %v949_v43 = vpop.permute.xlu1 %948 }
 0x265   : > { %v670_v46 = vadd.f32 %v669_v45, %v477_v41  ;;  %vm2320_vm0 = vmpackc.low %vm1099_vm4, %vm1097_vm15  ;;  %vm1833_vm4 = vcmask 1040384  }
 0x266   : > { %vm1098_vm5 = vmand %vm1086_vm6, %vm1094_vm7  ;;  %vm1836_vm6 = vcmask 1041408  }
 0x267   : > { %v2147_v48 = vpop.f32.mrb[14].mxu1  ;;  %2198 = vmatprep.mubr.f32.mxu0 %v670_v46  ;;  %vm2322_vm8 = vmpackc.low %vm1098_vm5, %vm1096_vm1 }
 0x268   : > { %v679_v53 = vpop.f32.mrb[15].mxu1  ;;  %2199 = vmatmul.mubr.f32.gmra.mrb[16].mxu0 %v675_v47  ;;  %v685_v56 = vadd.f32 %v2147_v48, %v492_v54  ;;  %v954_v47 = vpop.permute.xlu0 %953  ;;  %vm2976_vm12 = vmmov %vm2975_vm11 }
 0x269   : > { %v680_v55 = vadd.f32 %v679_v53, %v487_v49  ;;  %v959_v53 = vpop.permute.xlu1 %958 }
 0x26b   : > { %2201 = vmatprep.mubr.f32.mxu0 %v680_v55 }
 0x26c   : > { %2202 = vmatmul.mubr.f32.gmra.mrb[18].mxu0 %v685_v56  ;;  %v964_v55 = vpop.permute.xlu0 %963 }
 0x26d   : > { %1448 = vmatprep.mubr.f32.mxu0 %v2394_v5  ;;  %v969_v57 = vpop.permute.xlu1 %968 }
 0x323   : > { %v2182_v58 = vpop.f32.mrb[4].mxu0 }
 0x324   : > { %v840_v59 = vpop.f32.mrb[5].mxu0 }
 0x325   : > { %v2288_v60 = vpack.c.bf16 %v2182_v58, %v840_v59  ;;  %v974_v59 = vpop.permute.xlu0 %973 }
 0x327   : > { %v2185_v61 = vpop.f32.mrb[6].mxu0  ;;  %2289 = vmatprep.subr.bf16.mxu1 %v2288_v60 }
 0x328   : > { %v850_v62 = vpop.f32.mrb[7].mxu0  ;;  %2291 = vmatpush3.bf16.msra.mxu1 %v2288_v60 }
 0x329   : > { %v2292_v63 = vpack.c.bf16 %v2185_v61, %v850_v62  ;;  %v1160_v61 = vsub.s32 2, %v2581_v50  ;;  %v2850_v62 = vld [vmem:[%s209_s30] sm:$0xf] }
 0x32b   : > { %v2188_v0 = vpop.f32.mrb[8].mxu0  ;;  %2293 = vmatprep.subr.bf16.mxu1 %v2292_v63 }
 0x32c   : > { %v860_v1 = vpop.f32.mrb[9].mxu0  ;;  %2295 = vmatpush3.bf16.msra.mxu1 %v2292_v63  ;;  %v1157_v63 = vrot.slane %v2850_v62, %v2587_v51 }
 0x32d   : > { %v2296_v2 = vpack.c.bf16 %v2188_v0, %v860_v1  ;;  %v1161_v0 = vrot.slane %v2850_v62, %v1160_v61 }
 0x32e   : > { %v2856_v1 = vrot.slane %v1157_v63, %v2587_v51 }
 0x32f   : > { %v2191_v3 = vpop.f32.mrb[10].mxu0  ;;  %2297 = vmatprep.subr.bf16.mxu1 %v2296_v2 }
 0x330   : > { %v870_v7 = vpop.f32.mrb[11].mxu0  ;;  %2299 = vmatpush3.bf16.msra.mxu1 %v2296_v2  ;;  %v2859_v2 = vrot.slane %v1161_v0, %v2587_v51 }
 0x331   : > { %v2300_v8 = vpack.c.bf16 %v2191_v3, %v870_v7  ;;  %v1116_v3 = vpop.permute.xlu1 %1115 }
 0x332   : > { %v1172_v7 = vmul.f32 %v2856_v1, %v1116_v3 }
 0x333   : > { %v2194_v10 = vpop.f32.mrb[12].mxu0  ;;  %2301 = vmatprep.subr.bf16.mxu1 %v2300_v8 }
 0x334   : > { %v880_v11 = vpop.f32.mrb[13].mxu0  ;;  %2303 = vmatpush3.bf16.msra.mxu1 %v2300_v8  ;;  %v1173_v8 = vmul.f32 %v2859_v2, %v1116_v3 }
 0x335   : > { %v2304_v12 = vpack.c.bf16 %v2194_v10, %v880_v11  ;;  %v1121_v10 = vpop.permute.xlu0 %1120 }
 0x337   : > { %v2197_v13 = vpop.f32.mrb[14].mxu0  ;;  %2305 = vmatprep.subr.bf16.mxu1 %v2304_v12 }
 0x338   : > { %v890_v14 = vpop.f32.mrb[15].mxu0  ;;  %2307 = vmatpush3.bf16.msra.mxu1 %v2304_v12 }
 0x339   : > { %v2308_v16 = vpack.c.bf16 %v2197_v13, %v890_v14 }
 0x33b   : > { %v2200_v6 = vpop.f32.mrb[16].mxu0  ;;  %2309 = vmatprep.subr.bf16.mxu1 %v2308_v16 }
 0x33c   : > { %v900_v17 = vpop.f32.mrb[17].mxu0  ;;  %2311 = vmatpush3.bf16.msra.mxu1 %v2308_v16  ;;  %v1174_v16 = vmul.f32 %v2856_v1, %v1121_v10 }
 0x33d   : > { %v2312_v18 = vpack.c.bf16 %v2200_v6, %v900_v17  ;;  %v1126_v6 = vpop.permute.xlu1 %1125  ;;  %v1175_v17 = vmul.f32 %v2859_v2, %v1121_v10 }
 0x33f   : > { %v2203_v9 = vpop.f32.mrb[18].mxu0  ;;  %2313 = vmatprep.subr.bf16.mxu1 %v2312_v18 }
 0x340   : > { %v910_v19 = vpop.f32.mrb[19].mxu0  ;;  %2315 = vmatpush3.bf16.msra.mxu1 %v2312_v18 }
 0x341   : > { %v2316_v20 = vpack.c.bf16 %v2203_v9, %v910_v19  ;;  %v1136_v33 = vpop.permute.xlu1 %1135 }
 0x343   : > { %2317 = vmatprep.subr.bf16.mxu1 %v2316_v20 }
 0x344   : > { %2319 = vmatpush3.bf16.msra.mxu1 %v2316_v20  ;;  %v1176_v20 = vmul.f32 %v2856_v1, %v1126_v6 }
 0x345   : > { %2321 = vmatprep.subr.msk.bf16.mxu1 %vm2320_vm0, %v2393_v34 }
 0x347   : > { %2237 = vmatmul.mubr.f32.vlgmr.msra.gmra.mrb[16].mxu1 %v920_v21 }
 0x348   : > { %2239 = vmatprep.mubr.f32.mxu1 %v921_v22  ;;  %2323 = vmatpush1.bf16.msk.msra.mxu1 %vm2322_vm8, %v2393_v34 }
 0x34b   : > { %2240 = vmatmul.mubr.f32.gmra.mrb[18].mxu1 %v922_v23  ;;  %v1177_v23 = vmul.f32 %v2859_v2, %v1126_v6 }
 0x34c   : > { %2242 = vmatprep.mubr.f32.mxu1 %v923_v15  ;;  %v1131_v15 = vpop.permute.xlu0 %1130 }
 0x34d   : > { %v1178_v32 = vmul.f32 %v2856_v1, %v1131_v15  ;;  %v1179_v34 = vmul.f32 %v2859_v2, %v1131_v15 }
 0x34f   : > { %2243 = vmatmul.mubr.f32.gmra.mrb[20].mxu1 %v924_v24 }
 0x350   : > { %2245 = vmatprep.mubr.f32.mxu1 %v925_v25 }
 0x353   : > { %2246 = vmatmul.mubr.f32.gmra.mrb[22].mxu1 %v926_v26 }
 0x354   : > { %1277 = vmatprep.mubr.f32.mxu1 %v2394_v5 }
 0x41a   : > { %v2238_v35 = vpop.f32.mrb[16].mxu1 }
 0x41b   : > { %v1042_v37 = vpop.f32.mrb[17].mxu1  ;;  %v1048_v41 = vadd.f32 %v2238_v35, %v944_v4 }
 0x41c   : > { %v1043_v38 = vadd.f32 %v1042_v37, %v939_v36 }
 0x41e   : > { %v2241_v39 = vpop.f32.mrb[18].mxu1  ;;  %1999 = vmatmul.mubr.msk.f32.vlgmr.msra.gmra.mrb[24].mxu1 %vm1188_vm9, %v1043_v38 }
 0x41f   : > { %v1052_v40 = vpop.f32.mrb[19].mxu1  ;;  %1283 = vmatprep.mubr.f32.mxu1 %v2394_v5  ;;  %v1058_v49 = vadd.f32 %v2241_v39, %v954_v47  ;;  %v1180_v39 = vmul.f32 %v2856_v1, %v1136_v33 }
 0x420   : > { %v1053_v45 = vadd.f32 %v1052_v40, %v949_v43 }
 0x422   : > { %v2244_v42 = vpop.f32.mrb[20].mxu1  ;;  %2000 = vmatmul.mubr.msk.f32.gmra.mrb[26].mxu1 %vm1188_vm9, %v1048_v41  ;;  %v1181_v41 = vmul.f32 %v2859_v2, %v1136_v33 }
 0x423   : > { %v1062_v44 = vpop.f32.mrb[21].mxu1  ;;  %1289 = vmatprep.mubr.f32.mxu1 %v2394_v5  ;;  %v1068_v56 = vadd.f32 %v2244_v42, %v964_v55  ;;  %v1141_v42 = vpop.permute.xlu0 %1140 }
 0x424   : > { %v1063_v54 = vadd.f32 %v1062_v44, %v959_v53  ;;  %v1146_v55 = vpop.permute.xlu1 %1145 }
 0x425   : > { %v1184_v61 = vmul.f32 %v2856_v1, %v1146_v55  ;;  %v1185_v3 = vmul.f32 %v2859_v2, %v1146_v55 }
 0x426   : > { %v2247_v46 = vpop.f32.mrb[22].mxu1  ;;  %2001 = vmatmul.mubr.msk.f32.gmra.mrb[28].mxu1 %vm1188_vm9, %v1053_v45 }
 0x427   : > { %v1072_v48 = vpop.f32.mrb[23].mxu1  ;;  %1295 = vmatprep.mubr.f32.mxu1 %v2394_v5  ;;  %v1078_v60 = vadd.f32 %v2247_v46, %v974_v59 }
 0x428   : > { %v1073_v58 = vadd.f32 %v1072_v48, %v969_v57 }
 0x42a   : > { %2002 = vmatmul.mubr.msk.f32.gmra.mrb[30].mxu1 %vm1188_vm9, %v1058_v49 }
 0x42b   : > { %1301 = vmatprep.mubr.f32.mxu1 %v2394_v5 }
 0x42e   : > { %2003 = vmatmul.mubr.msk.f32.gmra.mrb[32].mxu1 %vm1188_vm9, %v1063_v54  ;;  %v1182_v54 = vmul.f32 %v2856_v1, %v1141_v42 }
 0x42f   : > { %1307 = vmatprep.mubr.f32.mxu1 %v2394_v5 }
 0x432   : > { %2004 = vmatmul.mubr.msk.f32.gmra.mrb[34].mxu1 %vm1188_vm9, %v1068_v56  ;;  %v1183_v56 = vmul.f32 %v2859_v2, %v1141_v42 }
 0x433   : > { %1313 = vmatprep.mubr.f32.mxu1 %v2394_v5 }
 0x436   : > { %2005 = vmatmul.mubr.msk.f32.gmra.mrb[36].mxu1 %vm1188_vm9, %v1073_v58 }
 0x437   : > { %1319 = vmatprep.mubr.f32.mxu1 %v2394_v5 }
 0x43a   : > { %2006 = vmatmul.mubr.msk.f32.gmra.mrb[38].mxu1 %vm1188_vm9, %v1078_v60 }
 0x43b   : > { %1658 = vmatprep.mubr.f32.mxu1 %v2394_v5 }
 0x4f1   : > { %v1279_v11 = vpop.f32.mrb[24].mxu1 }
 0x4f2   : > { %v1280_v12 = vadd.f32 %v1279_v11, %v1172_v7  ;;  %v1281_v13 = vpop.f32.mrb[25].mxu1  ;;  %v1151_v7 = vpop.permute.xlu0 %1150 }
 0x4f3   : > { %v1282_v14 = vadd.f32 %v1281_v13, %v1173_v8 }
 0x4f4   : > { %v1326_v21 = vmax.f32 %v1280_v12, 0.0 }
 0x4f5   : > { %v1285_v18 = vpop.f32.mrb[26].mxu1  ;;  %v1327_v24 = vmax.f32 %v1282_v14, 0.0 }
 0x4f6   : > { %v1286_v9 = vadd.f32 %v1285_v18, %v1174_v16  ;;  %v1287_v19 = vpop.f32.mrb[27].mxu1  ;;  %v1187_v18 = vmul.f32 %v2859_v2, %v1151_v7  ;;  %v1343_v2 = vld [vmem:[%s2939_s2 + $0xe8] sm:$0xff] }
 0x4f7   : > { %v1288_v51 = vadd.f32 %v1287_v19, %v1175_v17  ;;  %v1186_v17 = vmul.f32 %v2856_v1, %v1151_v7  ;;  %v1342_v1 = vld [vmem:[%s2939_s2 + $0xe0] sm:$0xff] }
 0x4f8   : > { %v1328_v22 = vmax.f32 %v1286_v9, 0.0 }
 0x4f9   : > { %v1329_v25 = vmax.f32 %v1288_v51, 0.0  ;;  %v1291_v26 = vpop.f32.mrb[28].mxu1 }
 0x4fa   : > { %v2326_v27 = vpack.c.bf16 %v1328_v22, %v1326_v21  ;;  %v1292_v28 = vadd.f32 %v1291_v26, %v1176_v20  ;;  %v1293_v29 = vpop.f32.mrb[29].mxu1  ;;  %v1344_v26 = vld [vmem:[%s2939_s2 + $0xf0] sm:$0xff] }
 0x4fb   : > { %v2324_v30 = vpack.c.bf16 %v1329_v25, %v1327_v24  ;;  %v1294_v31 = vadd.f32 %v1293_v29, %v1177_v23 }
 0x4fc   : > { %v1330_v4 = vmax.f32 %v1292_v28, 0.0 }
 0x4fd   : > { %v1297_v35 = vpop.f32.mrb[30].mxu1  ;;  %2325 = vmatprep.subr.bf16.mxu0 %v2324_v30  ;;  %v1331_v43 = vmax.f32 %v1294_v31, 0.0  ;;  %v1354_v30 = vpop.permute.xlu1 %1353 }
 0x4fe   : > { %v1298_v36 = vadd.f32 %v1297_v35, %v1178_v32  ;;  %v1299_v37 = vpop.f32.mrb[31].mxu1  ;;  %2327 = vmatpush1.bf16.msra.mxu0 %v2326_v27  ;;  %v1345_v27 = vld [vmem:[%s2939_s2 + $0xf8] sm:$0xff]  ;;  %v1359_v32 = vpop.permute.xlu0 %1358 }
 0x4ff   : > { %v1300_v38 = vadd.f32 %v1299_v37, %v1179_v34 }
 0x500   : > { %v1332_v40 = vmax.f32 %v1298_v36, 0.0 }
 0x501   : > { %v1333_v44 = vmax.f32 %v1300_v38, 0.0  ;;  %v1303_v45 = vpop.f32.mrb[32].mxu1 }
 0x502   : > { %v2330_v46 = vpack.c.bf16 %v1332_v40, %v1330_v4  ;;  %v1304_v47 = vadd.f32 %v1303_v45, %v1180_v39  ;;  %v1305_v48 = vpop.f32.mrb[33].mxu1 }
 0x503   : > { %v2328_v49 = vpack.c.bf16 %v1333_v44, %v1331_v43  ;;  %v1306_v53 = vadd.f32 %v1305_v48, %v1181_v41  ;;  %v1364_v44 = vpop.permute.xlu1 %1363 }
 0x504   : > { %v1334_v63 = vmax.f32 %v1304_v47, 0.0  ;;  %v1369_v47 = vpop.permute.xlu0 %1368 }
 0x505   : > { %v1309_v57 = vpop.f32.mrb[34].mxu1  ;;  %2329 = vmatprep.subr.bf16.mxu0 %v2328_v49  ;;  %v1335_v8 = vmax.f32 %v1306_v53, 0.0 }
 0x506   : > { %v1310_v58 = vadd.f32 %v1309_v57, %v1182_v54  ;;  %v1311_v59 = vpop.f32.mrb[35].mxu1  ;;  %2331 = vmatpush1.bf16.msra.mxu0 %v2330_v46 }
 0x507   : > { %v1312_v60 = vadd.f32 %v1311_v59, %v1183_v56 }
 0x508   : > { %v1336_v0 = vmax.f32 %v1310_v58, 0.0 }
 0x509   : > { %v1337_v10 = vmax.f32 %v1312_v60, 0.0  ;;  %v1315_v11 = vpop.f32.mrb[36].mxu1 }
 0x50a   : > { %v2334_v12 = vpack.c.bf16 %v1336_v0, %v1334_v63  ;;  %v1316_v13 = vadd.f32 %v1315_v11, %v1184_v61  ;;  %v1317_v14 = vpop.f32.mrb[37].mxu1  ;;  %v1481_v63 = vld [vmem:[%s2939_s2 + $0x100] sm:$0xff]  ;;  %v1482_v0 = vld [vmem:[%s2939_s2 + $0x108] sm:$0xff]  ;;  %v1494_v11 = vpop.permute.xlu0 %1493 }
 0x50b   : > { %v2332_v16 = vpack.c.bf16 %v1337_v10, %v1335_v8  ;;  %v1318_v6 = vadd.f32 %v1317_v14, %v1185_v3  ;;  %v1489_v8 = vpop.permute.xlu1 %1488 }
 0x50c   : > { %v1338_v21 = vmax.f32 %v1316_v13, 0.0 }
 0x50d   : > { %v1321_v9 = vpop.f32.mrb[38].mxu1  ;;  %2333 = vmatprep.subr.bf16.mxu0 %v2332_v16  ;;  %v1339_v23 = vmax.f32 %v1318_v6, 0.0 }
 0x50e   : > { %v1322_v19 = vadd.f32 %v1321_v9, %v1186_v17  ;;  %v1323_v51 = vpop.f32.mrb[39].mxu1  ;;  %2335 = vmatpush1.bf16.msra.mxu0 %v2334_v12 }
 0x50f   : > { %v1324_v20 = vadd.f32 %v1323_v51, %v1187_v18 }
 0x510   : > { %v1340_v22 = vmax.f32 %v1322_v19, 0.0 }
 0x511   : > { %v1341_v15 = vmax.f32 %v1324_v20, 0.0 }
 0x512   : > { %v2338_v24 = vpack.c.bf16 %v1340_v22, %v1338_v21  ;;  %v1589_v21 = vpop.permute.xlu1 %1588 }
 0x513   : > { %v2336_v25 = vpack.c.bf16 %v1341_v15, %v1339_v23 }
 0x515   : > { %2337 = vmatprep.subr.bf16.mxu0 %v2336_v25 }
 0x516   : > { %2339 = vmatpush1.bf16.msra.mxu0 %v2338_v24 }
 0x519   : > { %2011 = vmatmul.mubr.msk.f32.vlgmr.msra.gmra.mrb[20].mxu0 %vm1371_vm10, %v1342_v1 }
 0x51a   : > { %1454 = vmatprep.mubr.f32.mxu0 %v2394_v5 }
 0x51d   : > { %2012 = vmatmul.mubr.msk.f32.gmra.mrb[22].mxu0 %vm1371_vm10, %v1343_v2  ;;  %v1667_v2 = vld [vmem:[%s2939_s2 + $0x118] sm:$0x3] }
 0x51e   : > { %1460 = vmatprep.mubr.f32.mxu0 %v2394_v5 }
 0x521   : > { %2013 = vmatmul.mubr.msk.f32.gmra.mrb[24].mxu0 %vm1371_vm10, %v1344_v26  ;;  %v1673_v26 = vpop.permute.xlu0 %1672 }
 0x522   : > { %1466 = vmatprep.mubr.f32.mxu0 %v2394_v5 }
 0x525   : > { %2014 = vmatmul.mubr.msk.f32.gmra.mrb[26].mxu0 %vm1371_vm10, %v1345_v27 }
 0x526   : > { %1566 = vmatprep.mubr.f32.mxu0 %v2394_v5 }
 0x5ec   : > { %v1450_v28 = vpop.f32.mrb[20].mxu0 }
 0x5ed   : > { %v1452_v29 = vpop.f32.mrb[21].mxu0  ;;  %v1451_v31 = vadd.f32 %v1450_v28, %v1354_v30 }
 0x5ee   : > { %v1453_v33 = vadd.f32 %v1452_v29, %v1354_v30 }
 0x5ef   : > { %v1473_v38 = vmax.f32 %v1451_v31, 0.0 }
 0x5f0   : > { %v1456_v34 = vpop.f32.mrb[22].mxu0  ;;  %v1474_v4 = vmax.f32 %v1453_v33, 0.0 }
 0x5f1   : > { %v1457_v35 = vadd.f32 %v1456_v34, %v1359_v32  ;;  %v1458_v36 = vpop.f32.mrb[23].mxu0 }
 0x5f2   : > { %v1459_v37 = vadd.f32 %v1458_v36, %v1359_v32 }
 0x5f3   : > { %v1475_v39 = vmax.f32 %v1457_v35, 0.0 }
 0x5f4   : > { %v1476_v40 = vmax.f32 %v1459_v37, 0.0  ;;  %v1462_v41 = vpop.f32.mrb[24].mxu0 }
 0x5f5   : > { %v2342_v42 = vpack.c.bf16 %v1475_v39, %v1473_v38  ;;  %v1464_v43 = vpop.f32.mrb[25].mxu0  ;;  %v1463_v46 = vadd.f32 %v1462_v41, %v1364_v44 }
 0x5f6   : > { %v2340_v45 = vpack.c.bf16 %v1476_v40, %v1474_v4  ;;  %v1465_v48 = vadd.f32 %v1464_v43, %v1364_v44 }
 0x5f7   : > { %v1477_v56 = vmax.f32 %v1463_v46, 0.0  ;;  %v2395_v46 = vmov 1983009808  }
 0x5f8   : > { %v1468_v49 = vpop.f32.mrb[26].mxu0  ;;  %2341 = vmatprep.subr.bf16.mxu0 %v2340_v45  ;;  %v1478_v58 = vmax.f32 %v1465_v48, 0.0 }
 0x5f9   : > { %v1469_v53 = vadd.f32 %v1468_v49, %v1369_v47  ;;  %v1470_v54 = vpop.f32.mrb[27].mxu0  ;;  %2343 = vmatpush1.bf16.msra.mxu0 %v2342_v42 }
 0x5fa   : > { %v1471_v55 = vadd.f32 %v1470_v54, %v1369_v47  ;;  %v1785_v47 = vunpack.c.l.s4 %v2395_v46 }
 0x5fb   : > { %v1479_v57 = vmax.f32 %v1469_v53, 0.0 }
 0x5fc   : > { %v1480_v59 = vmax.f32 %v1471_v55, 0.0 }
 0x5fd   : > { %v2346_v60 = vpack.c.bf16 %v1479_v57, %v1477_v56 }
 0x5fe   : > { %v2344_v61 = vpack.c.bf16 %v1480_v59, %v1478_v58  ;;  %v1786_v59 = vunpack.c.0.s8 %v1785_v47 }
 0x600   : > { %2345 = vmatprep.subr.bf16.mxu0 %v2344_v61  ;;  %v1789_v61 = vsub.s32 %v1786_v59, %v2581_v50 }
 0x601   : > { %2347 = vmatpush1.bf16.msra.mxu0 %v2346_v60 }
 0x604   : > { %2017 = vmatmul.mubr.msk.f32.vlgmr.msra.gmra.mrb[28].mxu0 %vm2975_vm11, %v1481_v63 }
 0x605   : > { %1572 = vmatprep.mubr.f32.mxu0 %v2394_v5 }
 0x608   : > { %2018 = vmatmul.mubr.msk.f32.gmra.mrb[30].mxu0 %vm2976_vm12, %v1482_v0 }
 0x609   : > { %1742 = vmatprep.mubr.f32.mxu0 %v2394_v5  ;;  %v1583_v5 = vld [vmem:[%s2939_s2 + $0x110] sm:$0xff] }
 0x6d7   : > { %v1568_v3 = vpop.f32.mrb[28].mxu0 }
 0x6d8   : > { %v1570_v7 = vpop.f32.mrb[29].mxu0  ;;  %v1569_v10 = vadd.f32 %v1568_v3, %v1489_v8 }
 0x6d9   : > { %v1571_v12 = vadd.f32 %v1570_v7, %v1489_v8 }
 0x6da   : > { %v1579_v17 = vmax.f32 %v1569_v10, 0.0 }
 0x6db   : > { %v1574_v13 = vpop.f32.mrb[30].mxu0  ;;  %v1580_v9 = vmax.f32 %v1571_v12, 0.0 }
 0x6dc   : > { %v1575_v14 = vadd.f32 %v1574_v13, %v1494_v11  ;;  %v1576_v16 = vpop.f32.mrb[31].mxu0 }
 0x6dd   : > { %v1577_v6 = vadd.f32 %v1576_v16, %v1494_v11 }
 0x6de   : > { %v1581_v18 = vmax.f32 %v1575_v14, 0.0 }
 0x6df   : > { %v1582_v19 = vmax.f32 %v1577_v6, 0.0 }
 0x6e0   : > { %v2350_v51 = vpack.c.bf16 %v1581_v18, %v1579_v17  ;;  %v1821_v18 = vsub.s32 3, %v2581_v50 }
 0x6e1   : > { %v2348_v20 = vpack.c.bf16 %v1582_v19, %v1580_v9 }
 0x6e3   : > { %2349 = vmatprep.subr.bf16.mxu1 %v2348_v20 }
 0x6e4   : > { %2351 = vmatpush1.bf16.msra.mxu1 %v2350_v51 }
 0x6e7   : > { %2020 = vmatmul.mubr.msk.f32.vlgmr.msra.gmra.mrb[40].mxu1 %vm1188_vm9, %v1583_v5 }
 0x7ba   : > { %v1660_v22 = vpop.f32.mrb[40].mxu1 }
 0x7bb   : > { %v1661_v23 = vadd.f32 %v1660_v22, %v1589_v21  ;;  %v1662_v15 = vpop.f32.mrb[41].mxu1 }
 0x7bc   : > { %v1663_v24 = vadd.f32 %v1662_v15, %v1589_v21 }
 0x7bd   : > { %v1665_v1 = vmax.f32 %v1661_v23, 0.0 }
 0x7be   : > { %v1666_v25 = vmax.f32 %v1663_v24, 0.0 }
 0x7c0   : > { %1678 = vmatprep.subr.mxu0 %v1666_v25 }
 0x7c1   : > { %1679 = vmatpush1.msra.mxu0 %v1665_v1 }
 0x7c2   : > { %2022 = vmatmul.mubr.msk.f32.vlgmr.msra.gmra.mrb[32].mxu0 %vm2977_vm13, %v1667_v2 }
 0x895   : > { %v1744_v27 = vpop.f32.mrb[32].mxu0 }
 0x896   : > { %v2911_v28 = vadd.f32 %v1744_v27, %v1673_v26  ;;  %v1746_v29 = vpop.f32.mrb[33].mxu0 }
 0x897   : > { %v2913_v30 = vadd.f32 %v1746_v29, %v1673_v26 }
 0x898   : > { %v1751_v31 = vmin.f32 %v2911_v28, 20.0  ;;  %vm1749_vm15 = vcmp.gt.f32.partialorder %v2911_v28, 20.0 }
 0x899   : > { %v1752_v32 = vmin.f32 %v2913_v30, 20.0  ;;  %v1783_v33 = vcombine.low %v2911_v28, %v2913_v30  ;;  %vm1750_vm3 = vcmp.gt.f32.partialorder %v2913_v30, 20.0 }
 0x89a   : > { %v1753_v34 = vmul.f32 1.442695, %v1751_v31 }
 0x89b   : > { %v1755_v35 = vmul.f32 1.442695, %v1752_v32  ;;  %v1790_v63 = vrot.slane %v1783_v33, %v1789_v61 }
 0x89c   : > { %2367 = vpow2.f32 %v1753_v34 }
 0x89d   : > { %2369 = vpow2.f32 %v1755_v35  ;;  %v1791_v3 = vrot.slane %v1790_v63, 7 }
 0x89f   : > { %v1793_v11 = vsub.f32 %v2850_v62, %v1791_v3 }
 0x8a6   : > { %v2368_v36 = vpop.eup %2367 }
 0x8a7   : > { %v2370_v37 = vpop.eup %2369  ;;  %v1757_v38 = vadd.f32 1.0, %v2368_v36  ;;  %v1760_v4 = vmul.f32 -0.5, %v2368_v36  ;;  %v1763_v42 = vand.u32 2147483647, %v2368_v36 }
 0x8a8   : > { %v1766_v39 = vadd.f32 1.0, %v2370_v37  ;;  %v1769_v40 = vmul.f32 -0.5, %v2370_v37  ;;  %v1772_v44 = vand.u32 2147483647, %v2370_v37 }
 0x8a9   : > { %2371 = vlog2.f32 %v1757_v38  ;;  %v1761_v41 = vadd.f32 1.0, %v1760_v4  ;;  %vm1764_vm14 = vcmp.lt.f32.partialorder %v1763_v42, 0.0004427343 }
 0x8aa   : > { %2373 = vlog2.f32 %v1766_v39  ;;  %v1770_v43 = vadd.f32 1.0, %v1769_v40  ;;  %vm1773_vm2 = vcmp.lt.f32.partialorder %v1772_v44, 0.0004427343 }
 0x8ab   : > { %v1762_v53 = vmul.f32 %v2368_v36, %v1761_v41 }
 0x8ac   : > { %v1771_v55 = vmul.f32 %v2370_v37, %v1770_v43 }
 0x8b3   : > { %v2372_v45 = vpop.eup %2371 }
 0x8b4   : > { %v2374_v48 = vpop.eup %2373  ;;  %v1759_v49 = vmul.f32 0.6931472, %v2372_v45 }
 0x8b5   : > { %v1768_v54 = vmul.f32 0.6931472, %v2374_v48 }
 0x8b6   : > { %v1765_v56 = vsel %vm1764_vm14, %v1762_v53, %v1759_v49 }
 0x8b7   : > { %v1775_v57 = vsel %vm1749_vm15, %v2911_v28, %v1765_v56  ;;  %v1774_v58 = vsel %vm1773_vm2, %v1771_v55, %v1768_v54 }
 0x8b8   : > { %2375 = vrcp.f32 %v1775_v57  ;;  %v1776_v60 = vsel %vm1750_vm3, %v2913_v30, %v1774_v58  ;;  %v1834_v15 = vsel %vm1833_vm4, %v2911_v28, %v1775_v57 }
 0x8b9   : > { %2377 = vrcp.f32 %v1776_v60  ;;  %v1835_v24 = vsel %vm1833_vm4, %v2913_v30, %v1776_v60 }
 0x8ba   : > { %2379 = vlog2.f32 %v1775_v57 }
 0x8bb   : > { %2381 = vlog2.f32 %v1776_v60 }
 0x8c2   : > { %v2376_v0 = vpop.eup %2375 }
 0x8c3   : > { %v2378_v7 = vpop.eup %2377 }
 0x8c4   : > { %v1796_v8 = vcombine.low %v2376_v0, %v2378_v7  ;;  %v2380_v10 = vpop.eup %2379 }
 0x8c5   : > { %v2382_v13 = vpop.eup %2381  ;;  %v1807_v16 = vmul.f32 0.6931472, %v2380_v10 }
 0x8c6   : > { %v1803_v12 = vrot.slane %v1796_v8, %v1789_v61  ;;  %v1809_v6 = vmul.f32 0.6931472, %v2382_v13 }
 0x8c7   : > { %v1810_v19 = vsub.f32 -0.9189385, %v1807_v16 }
 0x8c8   : > { %v1805_v14 = vmul.f32 %v1803_v12, %v1793_v11  ;;  %v1811_v51 = vsub.f32 -0.9189385, %v1809_v6 }
 0x8ca   : > { %v1812_v17 = vmul.f32 0.5, %v1805_v14 }
 0x8cc   : > { %v1813_v9 = vmul.f32 %v1812_v17, %v1805_v14 }
 0x8ce   : > { %v1818_v20 = vrot.slane %v1813_v9, %v238_v52  ;;  %v1822_v5 = vrot.slane %v1813_v9, %v1821_v18 }
 0x8d0   : > { %v1825_v21 = vsub.f32 %v1810_v19, %v1818_v20  ;;  %v1826_v22 = vsub.f32 %v1811_v51, %v1822_v5 }
 0x8d2   : > { %v1829_v62 = vrot.slane %v1825_v21, 7  ;;  %v1830_v23 = vrot.slane %v1826_v22, 7 }
 0x8d4   : > { %v1837_v25 = vsel %vm1836_vm6, %v1834_v15, %v1829_v62  ;;  %v1838_v1 = vsel %vm1836_vm6, %v1835_v24, %v1830_v23 }
 0x8d5   : > { %v1841_v50 = vcombine.low %v1837_v25, %v1838_v1 }
 0x8d7   : > { %1843 = vst [vmem:[%s214_s26] sm:$0x77] %v1841_v50 }
 0x8d8 PF: > { %s14_s15 = sadd.s32 1, %s2389_s15  }
 0x8d9   : > { %p11_p4 = scmp.ge.s32.totalorder %s14_s15, 4  }
 0x8db   :  { %13 = sbr.rel (!%p11_p4) target bundleno = 1 (0x1), region = 79 }

</bundles_post_ra>
